<compile_context>
chip_gen: v6e
topology: v6e:2x2x1
jax: 0.10.0
libtpu: 0.0.40
codegen_flags: <defaults>
</compile_context>

<pallas_src>
import functools

import jax
import jax.numpy as jnp
import numpy as np
from jax import lax
from jax.experimental import pallas as pl
from jax.experimental.pallas import tpu as pltpu


def _mha_kernel(xq_ref, xk_ref, xv_ref,
                wq_ref, wk_ref, wv_ref, wo_ref,
                bqkv_ref, bo_ref,
                o_ref, *, batch, seq_q, seq_k, num_heads, dim_q, dim_k):
    # Whole problem in one invocation. Batch rows live on the sublane axis
    # (Sq = Sk = 8 = one vreg of sublanes), so per-batch slicing below is a
    # free vreg selection, never a lane extract.
    xq = xq_ref[...].astype(jnp.bfloat16)      # (B*Sq, dim_in)
    xk = xk_ref[...].astype(jnp.bfloat16)      # (B*Sk, dim_in)
    xv = xv_ref[...].astype(jnp.bfloat16)      # (B*Sk, dim_in)
    biases = bqkv_ref[...]                     # (3*H, dim_q), f32

    heads = [[] for _ in range(batch)]         # heads[b][h] -> (Sq, dim_k) f32
    for h in range(num_heads):
        # Per-head weight slices are leading-axis views of the refs (free);
        # every MXU operand stays lane-contiguous (no value lane-slices).
        # The 1/sqrt(dim_q) score scale was folded into wq/bq at init time.
        q_h = (jnp.dot(xq, wq_ref[h], preferred_element_type=jnp.float32)
               + biases[h:h + 1, :])                                   # (B*Sq, dq)
        k_h = (jnp.dot(xk, wk_ref[h], preferred_element_type=jnp.float32)
               + biases[num_heads + h:num_heads + h + 1, :])           # (B*Sk, dk)
        v_h = (jnp.dot(xv, wv_ref[h], preferred_element_type=jnp.float32)
               + biases[2 * num_heads + h:2 * num_heads + h + 1, :])   # (B*Sk, dk)

        for b in range(batch):
            qb = q_h[b * seq_q:(b + 1) * seq_q, :].astype(jnp.bfloat16)  # sublane slice
            kb = k_h[b * seq_k:(b + 1) * seq_k, :].astype(jnp.bfloat16)
            vb = v_h[b * seq_k:(b + 1) * seq_k, :].astype(jnp.bfloat16)

            # Contract last axes directly (NT); no explicit k.T relayout.
            scores = lax.dot_general(qb, kb, (((1,), (1,)), ((), ())),
                                     preferred_element_type=jnp.float32)  # (Sq, Sk)

            m = jnp.max(scores, axis=-1, keepdims=True)
            p = jnp.exp(scores - m)
            denom = jnp.sum(p, axis=-1, keepdims=True)
            p = p * pl.reciprocal(denom, approx=True)    # EUP slot, frees VALU

            heads[b].append(jnp.dot(p.astype(jnp.bfloat16), vb,
                                    preferred_element_type=jnp.float32))  # (Sq, dk)

    # Single fused output projection for all batches & heads.
    cat = jnp.concatenate(
        [jnp.concatenate(heads[b], axis=-1) for b in range(batch)], axis=0)
    out = jnp.dot(cat.astype(jnp.bfloat16), wo_ref[...],
                  preferred_element_type=jnp.float32) + bo_ref[...]
    o_ref[...] = out.astype(o_ref.dtype)


def prepare_params(params):
    """One-time (init-time) parameter restacking; hoisted out of the forward path."""
    wq, bq, wk, bk, wv, bv, wo, bo = params
    H, dim_in, dim_q = wq.shape
    dim_k = wk.shape[-1]
    assert dim_q == dim_k, "bmm(q, k^T) in the reference module requires dim_q == dim_k"

    inv_scale = 1.0 / (float(dim_q) ** 0.5)
    wq_p = (wq * inv_scale).astype(jnp.bfloat16)                # (H, dim_in, dim_q)
    wk_p = wk.astype(jnp.bfloat16)                              # (H, dim_in, dim_k)
    wv_p = wv.astype(jnp.bfloat16)                              # (H, dim_in, dim_k)
    wo_p = wo.reshape(H * dim_k, dim_in).astype(jnp.bfloat16)   # (H*dim_k, dim_in)
    # Biases stay f32 (added after f32 accumulation); scale folded into bq too.
    b_qkv = jnp.concatenate([(bq * inv_scale).reshape(H, dim_q),
                             bk.reshape(H, dim_k),
                             bv.reshape(H, dim_k)], axis=0).astype(jnp.float32)
    bo_p = bo.reshape(1, dim_in).astype(jnp.float32)
    return wq_p, wk_p, wv_p, wo_p, b_qkv, bo_p


def multi_head_attention(query, key, value, prepared):
    """query: (B, Sq, dim_in), key/value: (B, Sk, dim_in) -> (B, Sq, dim_in)."""
    wq_p, wk_p, wv_p, wo_p, b_qkv, bo_p = prepared
    B, Sq, dim_in = query.shape
    Sk = key.shape[1]
    H, _, dim_q = wq_p.shape
    dim_k = wk_p.shape[-1]

    # Contiguous reshapes (metadata-only): fold batch onto the sublane axis.
    xq = query.reshape(B * Sq, dim_in)
    xk = key.reshape(B * Sk, dim_in)
    xv = value.reshape(B * Sk, dim_in)

    kernel = functools.partial(_mha_kernel, batch=B, seq_q=Sq, seq_k=Sk,
                               num_heads=H, dim_q=dim_q, dim_k=dim_k)

    # Advisory cost for XLA's scheduler (latency-bound regime).
    flops = 2 * (B * Sq * dim_in * H * dim_q          # q proj
                 + 2 * B * Sk * dim_in * H * dim_k    # k, v proj
                 + B * H * Sq * Sk * (dim_q + dim_k)  # scores + PV
                 + B * Sq * H * dim_k * dim_in)       # out proj
    transcendentals = B * H * Sq * (Sk + 1)
    bytes_accessed = int(sum(int(np.prod(a.shape)) * a.dtype.itemsize
                             for a in (xq, xk, xv, wq_p, wk_p, wv_p,
                                       wo_p, b_qkv, bo_p)))
    bytes_accessed += int(B * Sq * dim_in * query.dtype.itemsize)

    map2 = lambda i: (0, 0)
    map3 = lambda i: (0, 0, 0)

    out = pl.pallas_call(
        kernel,
        out_shape=jax.ShapeDtypeStruct((B * Sq, dim_in), query.dtype),
        grid_spec=pltpu.PrefetchScalarGridSpec(
            num_scalar_prefetch=0,
            grid=(1,),                                     # single invocation
            in_specs=[
                pl.BlockSpec((B * Sq, dim_in), map2),      # query  (batch-folded)
                pl.BlockSpec((B * Sk, dim_in), map2),      # key
                pl.BlockSpec((B * Sk, dim_in), map2),      # value
                pl.BlockSpec((H, dim_in, dim_q), map3),    # Wq (head-major, scale folded)
                pl.BlockSpec((H, dim_in, dim_k), map3),    # Wk
                pl.BlockSpec((H, dim_in, dim_k), map3),    # Wv
                pl.BlockSpec((H * dim_k, dim_in), map2),   # Wo (stacked)
                pl.BlockSpec((3 * H, dim_q), map2),        # bq/bk/bv packed (f32)
                pl.BlockSpec((1, dim_in), map2),           # bo (f32)
            ],
            out_specs=pl.BlockSpec((B * Sq, dim_in), map2),
        ),
        compiler_params=pltpu.CompilerParams(
            dimension_semantics=("arbitrary",),
        ),
        cost_estimate=pl.CostEstimate(flops=flops,
                                      transcendentals=transcendentals,
                                      bytes_accessed=bytes_accessed),
    )(xq, xk, xv, wq_p, wk_p, wv_p, wo_p, b_qkv, bo_p)
    return out.reshape(B, Sq, dim_in)


def _reference(query, key, value, params):
    """Pure-JAX f32 reference matching the PyTorch module semantics."""
    wq, bq, wk, bk, wv, bv, wo, bo = params
    H = wq.shape[0]
    heads = []
    for h in range(H):
        q = query @ wq[h] + bq[h]          # (B, Sq, dim_q)
        k = key @ wk[h] + bk[h]            # (B, Sk, dim_k)
        v = value @ wv[h] + bv[h]          # (B, Sk, dim_k)
        scores = jnp.einsum("bqd,bkd->bqk", q, k) / (q.shape[-1] ** 0.5)
        p = jax.nn.softmax(scores, axis=-1)
        heads.append(jnp.einsum("bqk,bkd->bqd", p, v))
    cat = jnp.concatenate(heads, axis=-1)  # (B, Sq, H*dim_k)
    return cat @ wo.reshape(H * wo.shape[1], -1) + bo[0]


if __name__ == "__main__":
    # Small shapes consistent with the module's forward.
    B, Sq, Sk = 2, 8, 8
    num_heads, dim_in, dim_q, dim_k = 4, 32, 16, 16  # dim_q == dim_k (required by bmm)

    key0 = jax.random.PRNGKey(0)
    ks = jax.random.split(key0, 12)

    query = jax.random.normal(ks[0], (B, Sq, dim_in), jnp.float32)
    key_ = jax.random.normal(ks[1], (B, Sk, dim_in), jnp.float32)
    value = jax.random.normal(ks[2], (B, Sk, dim_in), jnp.float32)

    s = 0.1
    wq = s * jax.random.normal(ks[3], (num_heads, dim_in, dim_q), jnp.float32)
    bq = s * jax.random.normal(ks[4], (num_heads, 1, dim_q), jnp.float32)
    wk = s * jax.random.normal(ks[5], (num_heads, dim_in, dim_k), jnp.float32)
    bk = s * jax.random.normal(ks[6], (num_heads, 1, dim_k), jnp.float32)
    wv = s * jax.random.normal(ks[7], (num_heads, dim_in, dim_k), jnp.float32)
    bv = s * jax.random.normal(ks[8], (num_heads, 1, dim_k), jnp.float32)
    # Output projection: PyTorch weight (dim_in, H*dim_k); stored as per-head
    # transposed slices Wo[h] = weight[:, h*dim_k:(h+1)*dim_k].T -> (H, dim_k, dim_in)
    wo = s * jax.random.normal(ks[9], (num_heads, dim_k, dim_in), jnp.float32)
    bo = s * jax.random.normal(ks[10], (1, dim_in), jnp.float32)

    params = (wq, bq, wk, bk, wv, bv, wo, bo)

    # One-time parameter preparation (hoisted out of the forward path).
    prepared = jax.tree_util.tree_map(jax.block_until_ready, prepare_params(params))

    out = multi_head_attention(query, key_, value, prepared)
    out = jax.block_until_ready(out)

    ref = _reference(query, key_, value, params)
    # Tolerance sized for bf16 MXU operands with f32 accumulation + approx reciprocal.
    np.testing.assert_allclose(np.asarray(out), np.asarray(ref), rtol=1e-2, atol=1e-2)

    print("KERNEL_OK")
</pallas_src>

<mosaic_0001>
module attributes {stable_mosaic.version = 11 : i64} {
  func.func @_mha_kernel(%arg0: i32, %arg1: memref<16x32xf32, #tpu.memory_space<vmem>>, %arg2: memref<16x32xf32, #tpu.memory_space<vmem>>, %arg3: memref<16x32xf32, #tpu.memory_space<vmem>>, %arg4: memref<4x32x16xbf16, #tpu.memory_space<vmem>>, %arg5: memref<4x32x16xbf16, #tpu.memory_space<vmem>>, %arg6: memref<4x32x16xbf16, #tpu.memory_space<vmem>>, %arg7: memref<64x32xbf16, #tpu.memory_space<vmem>>, %arg8: memref<12x16xf32, #tpu.memory_space<vmem>>, %arg9: memref<1x32xf32, #tpu.memory_space<vmem>>, %arg10: memref<16x32xf32, #tpu.memory_space<vmem>>) attributes {dimension_semantics = [#tpu.dimension_semantics<arbitrary>], iteration_bounds = array<i64: 1>, scalar_prefetch = 0 : i64, scratch_operands = 0 : i64, tpu.core_type = #tpu.core_type<tc>, window_params = [{pipeline_mode = #tpu.pipeline_mode<synchronous>, transform_indices = @transform_0, window_bounds = array<i64: 16, 32>}, {pipeline_mode = #tpu.pipeline_mode<synchronous>, transform_indices = @transform_1, window_bounds = array<i64: 16, 32>}, {pipeline_mode = #tpu.pipeline_mode<synchronous>, transform_indices = @transform_2, window_bounds = array<i64: 16, 32>}, {pipeline_mode = #tpu.pipeline_mode<synchronous>, transform_indices = @transform_3, window_bounds = array<i64: 4, 32, 16>}, {pipeline_mode = #tpu.pipeline_mode<synchronous>, transform_indices = @transform_4, window_bounds = array<i64: 4, 32, 16>}, {pipeline_mode = #tpu.pipeline_mode<synchronous>, transform_indices = @transform_5, window_bounds = array<i64: 4, 32, 16>}, {pipeline_mode = #tpu.pipeline_mode<synchronous>, transform_indices = @transform_6, window_bounds = array<i64: 64, 32>}, {pipeline_mode = #tpu.pipeline_mode<synchronous>, transform_indices = @transform_7, window_bounds = array<i64: 12, 16>}, {pipeline_mode = #tpu.pipeline_mode<synchronous>, transform_indices = @transform_8, window_bounds = array<i64: 1, 32>}, {pipeline_mode = #tpu.pipeline_mode<synchronous>, transform_indices = @transform_9, window_bounds = array<i64: 16, 32>}]} {
    %c0 = arith.constant 0 : index
    %c0_0 = arith.constant 0 : index
    %0 = vector.load %arg1[%c0, %c0_0] : memref<16x32xf32, #tpu.memory_space<vmem>>, vector<16x32xf32>
    %1 = arith.truncf %0 : vector<16x32xf32> to vector<16x32xbf16>
    %c0_1 = arith.constant 0 : index
    %c0_2 = arith.constant 0 : index
    %2 = vector.load %arg2[%c0_1, %c0_2] : memref<16x32xf32, #tpu.memory_space<vmem>>, vector<16x32xf32>
    %3 = arith.truncf %2 : vector<16x32xf32> to vector<16x32xbf16>
    %c0_3 = arith.constant 0 : index
    %c0_4 = arith.constant 0 : index
    %4 = vector.load %arg3[%c0_3, %c0_4] : memref<16x32xf32, #tpu.memory_space<vmem>>, vector<16x32xf32>
    %5 = arith.truncf %4 : vector<16x32xf32> to vector<16x32xbf16>
    %c0_5 = arith.constant 0 : index
    %c0_6 = arith.constant 0 : index
    %6 = vector.load %arg8[%c0_5, %c0_6] : memref<12x16xf32, #tpu.memory_space<vmem>>, vector<12x16xf32>
    %c0_7 = arith.constant 0 : index
    %c0_8 = arith.constant 0 : index
    %c0_9 = arith.constant 0 : index
    %7 = vector.load %arg4[%c0_7, %c0_8, %c0_9] : memref<4x32x16xbf16, #tpu.memory_space<vmem>>, vector<1x32x16xbf16>
    %8 = vector.shape_cast %7 : vector<1x32x16xbf16> to vector<32x16xbf16>
    %cst = arith.constant dense<0.000000e+00> : vector<16x16xf32>
    %9 = tpu.matmul %1, %8, %cst {dimension_numbers = #tpu.dot_dimension_numbers<[1], [0], [0], [1], [0, 0, 1, 1], [], []>} : vector<16x32xbf16>, vector<32x16xbf16>, vector<16x16xf32> -> vector<16x16xf32>
    %10 = vector.extract_strided_slice %6 {offsets = [0, 0], sizes = [1, 16], strides = [1, 1]} : vector<12x16xf32> to vector<1x16xf32>
    %11 = vector.broadcast %10 : vector<1x16xf32> to vector<16x16xf32>
    %12 = arith.addf %9, %11 : vector<16x16xf32>
    %c0_10 = arith.constant 0 : index
    %c0_11 = arith.constant 0 : index
    %c0_12 = arith.constant 0 : index
    %13 = vector.load %arg5[%c0_10, %c0_11, %c0_12] : memref<4x32x16xbf16, #tpu.memory_space<vmem>>, vector<1x32x16xbf16>
    %14 = vector.shape_cast %13 : vector<1x32x16xbf16> to vector<32x16xbf16>
    %cst_13 = arith.constant dense<0.000000e+00> : vector<16x16xf32>
    %15 = tpu.matmul %3, %14, %cst_13 {dimension_numbers = #tpu.dot_dimension_numbers<[1], [0], [0], [1], [0, 0, 1, 1], [], []>} : vector<16x32xbf16>, vector<32x16xbf16>, vector<16x16xf32> -> vector<16x16xf32>
    %16 = vector.extract_strided_slice %6 {offsets = [4, 0], sizes = [1, 16], strides = [1, 1]} : vector<12x16xf32> to vector<1x16xf32>
    %17 = vector.broadcast %16 : vector<1x16xf32> to vector<16x16xf32>
    %18 = arith.addf %15, %17 : vector<16x16xf32>
    %c0_14 = arith.constant 0 : index
    %c0_15 = arith.constant 0 : index
    %c0_16 = arith.constant 0 : index
    %19 = vector.load %arg6[%c0_14, %c0_15, %c0_16] : memref<4x32x16xbf16, #tpu.memory_space<vmem>>, vector<1x32x16xbf16>
    %20 = vector.shape_cast %19 : vector<1x32x16xbf16> to vector<32x16xbf16>
    %cst_17 = arith.constant dense<0.000000e+00> : vector<16x16xf32>
    %21 = tpu.matmul %5, %20, %cst_17 {dimension_numbers = #tpu.dot_dimension_numbers<[1], [0], [0], [1], [0, 0, 1, 1], [], []>} : vector<16x32xbf16>, vector<32x16xbf16>, vector<16x16xf32> -> vector<16x16xf32>
    %22 = vector.extract_strided_slice %6 {offsets = [8, 0], sizes = [1, 16], strides = [1, 1]} : vector<12x16xf32> to vector<1x16xf32>
    %23 = vector.broadcast %22 : vector<1x16xf32> to vector<16x16xf32>
    %24 = arith.addf %21, %23 : vector<16x16xf32>
    %25 = vector.extract_strided_slice %12 {offsets = [0, 0], sizes = [8, 16], strides = [1, 1]} : vector<16x16xf32> to vector<8x16xf32>
    %26 = arith.truncf %25 : vector<8x16xf32> to vector<8x16xbf16>
    %27 = vector.extract_strided_slice %18 {offsets = [0, 0], sizes = [8, 16], strides = [1, 1]} : vector<16x16xf32> to vector<8x16xf32>
    %28 = arith.truncf %27 : vector<8x16xf32> to vector<8x16xbf16>
    %29 = vector.extract_strided_slice %24 {offsets = [0, 0], sizes = [8, 16], strides = [1, 1]} : vector<16x16xf32> to vector<8x16xf32>
    %30 = arith.truncf %29 : vector<8x16xf32> to vector<8x16xbf16>
    %cst_18 = arith.constant dense<0.000000e+00> : vector<8x8xf32>
    %31 = tpu.matmul %26, %28, %cst_18 {dimension_numbers = #tpu.dot_dimension_numbers<[1], [1], [0], [0], [0, 0, 1, 0], [], []>} : vector<8x16xbf16>, vector<8x16xbf16>, vector<8x8xf32> -> vector<8x8xf32>
    %cst_19 = arith.constant dense<0xFF800000> : vector<8xf32>
    %32 = vector.multi_reduction <maximumf>, %31, %cst_19 [1] : vector<8x8xf32> to vector<8xf32>
    %33 = vector.shape_cast %32 : vector<8xf32> to vector<8x1xf32>
    %34 = vector.broadcast %33 : vector<8x1xf32> to vector<8x8xf32>
    %35 = arith.subf %31, %34 : vector<8x8xf32>
    %36 = math.exp %35 : vector<8x8xf32>
    %cst_20 = arith.constant dense<0.000000e+00> : vector<8xf32>
    %37 = vector.multi_reduction <add>, %36, %cst_20 [1] : vector<8x8xf32> to vector<8xf32>
    %38 = vector.shape_cast %37 : vector<8xf32> to vector<8x1xf32>
    %39 = tpu.reciprocal %38 {approx = true} : vector<8x1xf32> -> vector<8x1xf32>
    %40 = vector.broadcast %39 : vector<8x1xf32> to vector<8x8xf32>
    %41 = arith.mulf %36, %40 : vector<8x8xf32>
    %42 = arith.truncf %41 : vector<8x8xf32> to vector<8x8xbf16>
    %cst_21 = arith.constant dense<0.000000e+00> : vector<8x16xf32>
    %43 = tpu.matmul %42, %30, %cst_21 {dimension_numbers = #tpu.dot_dimension_numbers<[1], [0], [0], [1], [0, 0, 1, 1], [], []>} : vector<8x8xbf16>, vector<8x16xbf16>, vector<8x16xf32> -> vector<8x16xf32>
    %44 = vector.extract_strided_slice %12 {offsets = [8, 0], sizes = [8, 16], strides = [1, 1]} : vector<16x16xf32> to vector<8x16xf32>
    %45 = arith.truncf %44 : vector<8x16xf32> to vector<8x16xbf16>
    %46 = vector.extract_strided_slice %18 {offsets = [8, 0], sizes = [8, 16], strides = [1, 1]} : vector<16x16xf32> to vector<8x16xf32>
    %47 = arith.truncf %46 : vector<8x16xf32> to vector<8x16xbf16>
    %48 = vector.extract_strided_slice %24 {offsets = [8, 0], sizes = [8, 16], strides = [1, 1]} : vector<16x16xf32> to vector<8x16xf32>
    %49 = arith.truncf %48 : vector<8x16xf32> to vector<8x16xbf16>
    %cst_22 = arith.constant dense<0.000000e+00> : vector<8x8xf32>
    %50 = tpu.matmul %45, %47, %cst_22 {dimension_numbers = #tpu.dot_dimension_numbers<[1], [1], [0], [0], [0, 0, 1, 0], [], []>} : vector<8x16xbf16>, vector<8x16xbf16>, vector<8x8xf32> -> vector<8x8xf32>
    %cst_23 = arith.constant dense<0xFF800000> : vector<8xf32>
    %51 = vector.multi_reduction <maximumf>, %50, %cst_23 [1] : vector<8x8xf32> to vector<8xf32>
    %52 = vector.shape_cast %51 : vector<8xf32> to vector<8x1xf32>
    %53 = vector.broadcast %52 : vector<8x1xf32> to vector<8x8xf32>
    %54 = arith.subf %50, %53 : vector<8x8xf32>
    %55 = math.exp %54 : vector<8x8xf32>
    %cst_24 = arith.constant dense<0.000000e+00> : vector<8xf32>
    %56 = vector.multi_reduction <add>, %55, %cst_24 [1] : vector<8x8xf32> to vector<8xf32>
    %57 = vector.shape_cast %56 : vector<8xf32> to vector<8x1xf32>
    %58 = tpu.reciprocal %57 {approx = true} : vector<8x1xf32> -> vector<8x1xf32>
    %59 = vector.broadcast %58 : vector<8x1xf32> to vector<8x8xf32>
    %60 = arith.mulf %55, %59 : vector<8x8xf32>
    %61 = arith.truncf %60 : vector<8x8xf32> to vector<8x8xbf16>
    %cst_25 = arith.constant dense<0.000000e+00> : vector<8x16xf32>
    %62 = tpu.matmul %61, %49, %cst_25 {dimension_numbers = #tpu.dot_dimension_numbers<[1], [0], [0], [1], [0, 0, 1, 1], [], []>} : vector<8x8xbf16>, vector<8x16xbf16>, vector<8x16xf32> -> vector<8x16xf32>
    %c1 = arith.constant 1 : index
    %c0_26 = arith.constant 0 : index
    %c0_27 = arith.constant 0 : index
    %63 = vector.load %arg4[%c1, %c0_26, %c0_27] : memref<4x32x16xbf16, #tpu.memory_space<vmem>>, vector<1x32x16xbf16>
    %64 = vector.shape_cast %63 : vector<1x32x16xbf16> to vector<32x16xbf16>
    %cst_28 = arith.constant dense<0.000000e+00> : vector<16x16xf32>
    %65 = tpu.matmul %1, %64, %cst_28 {dimension_numbers = #tpu.dot_dimension_numbers<[1], [0], [0], [1], [0, 0, 1, 1], [], []>} : vector<16x32xbf16>, vector<32x16xbf16>, vector<16x16xf32> -> vector<16x16xf32>
    %66 = vector.extract_strided_slice %6 {offsets = [1, 0], sizes = [1, 16], strides = [1, 1]} : vector<12x16xf32> to vector<1x16xf32>
    %67 = vector.broadcast %66 : vector<1x16xf32> to vector<16x16xf32>
    %68 = arith.addf %65, %67 : vector<16x16xf32>
    %c1_29 = arith.constant 1 : index
    %c0_30 = arith.constant 0 : index
    %c0_31 = arith.constant 0 : index
    %69 = vector.load %arg5[%c1_29, %c0_30, %c0_31] : memref<4x32x16xbf16, #tpu.memory_space<vmem>>, vector<1x32x16xbf16>
    %70 = vector.shape_cast %69 : vector<1x32x16xbf16> to vector<32x16xbf16>
    %cst_32 = arith.constant dense<0.000000e+00> : vector<16x16xf32>
    %71 = tpu.matmul %3, %70, %cst_32 {dimension_numbers = #tpu.dot_dimension_numbers<[1], [0], [0], [1], [0, 0, 1, 1], [], []>} : vector<16x32xbf16>, vector<32x16xbf16>, vector<16x16xf32> -> vector<16x16xf32>
    %72 = vector.extract_strided_slice %6 {offsets = [5, 0], sizes = [1, 16], strides = [1, 1]} : vector<12x16xf32> to vector<1x16xf32>
    %73 = vector.broadcast %72 : vector<1x16xf32> to vector<16x16xf32>
    %74 = arith.addf %71, %73 : vector<16x16xf32>
    %c1_33 = arith.constant 1 : index
    %c0_34 = arith.constant 0 : index
    %c0_35 = arith.constant 0 : index
    %75 = vector.load %arg6[%c1_33, %c0_34, %c0_35] : memref<4x32x16xbf16, #tpu.memory_space<vmem>>, vector<1x32x16xbf16>
    %76 = vector.shape_cast %75 : vector<1x32x16xbf16> to vector<32x16xbf16>
    %cst_36 = arith.constant dense<0.000000e+00> : vector<16x16xf32>
    %77 = tpu.matmul %5, %76, %cst_36 {dimension_numbers = #tpu.dot_dimension_numbers<[1], [0], [0], [1], [0, 0, 1, 1], [], []>} : vector<16x32xbf16>, vector<32x16xbf16>, vector<16x16xf32> -> vector<16x16xf32>
    %78 = vector.extract_strided_slice %6 {offsets = [9, 0], sizes = [1, 16], strides = [1, 1]} : vector<12x16xf32> to vector<1x16xf32>
    %79 = vector.broadcast %78 : vector<1x16xf32> to vector<16x16xf32>
    %80 = arith.addf %77, %79 : vector<16x16xf32>
    %81 = vector.extract_strided_slice %68 {offsets = [0, 0], sizes = [8, 16], strides = [1, 1]} : vector<16x16xf32> to vector<8x16xf32>
    %82 = arith.truncf %81 : vector<8x16xf32> to vector<8x16xbf16>
    %83 = vector.extract_strided_slice %74 {offsets = [0, 0], sizes = [8, 16], strides = [1, 1]} : vector<16x16xf32> to vector<8x16xf32>
    %84 = arith.truncf %83 : vector<8x16xf32> to vector<8x16xbf16>
    %85 = vector.extract_strided_slice %80 {offsets = [0, 0], sizes = [8, 16], strides = [1, 1]} : vector<16x16xf32> to vector<8x16xf32>
    %86 = arith.truncf %85 : vector<8x16xf32> to vector<8x16xbf16>
    %cst_37 = arith.constant dense<0.000000e+00> : vector<8x8xf32>
    %87 = tpu.matmul %82, %84, %cst_37 {dimension_numbers = #tpu.dot_dimension_numbers<[1], [1], [0], [0], [0, 0, 1, 0], [], []>} : vector<8x16xbf16>, vector<8x16xbf16>, vector<8x8xf32> -> vector<8x8xf32>
    %cst_38 = arith.constant dense<0xFF800000> : vector<8xf32>
    %88 = vector.multi_reduction <maximumf>, %87, %cst_38 [1] : vector<8x8xf32> to vector<8xf32>
    %89 = vector.shape_cast %88 : vector<8xf32> to vector<8x1xf32>
    %90 = vector.broadcast %89 : vector<8x1xf32> to vector<8x8xf32>
    %91 = arith.subf %87, %90 : vector<8x8xf32>
    %92 = math.exp %91 : vector<8x8xf32>
    %cst_39 = arith.constant dense<0.000000e+00> : vector<8xf32>
    %93 = vector.multi_reduction <add>, %92, %cst_39 [1] : vector<8x8xf32> to vector<8xf32>
    %94 = vector.shape_cast %93 : vector<8xf32> to vector<8x1xf32>
    %95 = tpu.reciprocal %94 {approx = true} : vector<8x1xf32> -> vector<8x1xf32>
    %96 = vector.broadcast %95 : vector<8x1xf32> to vector<8x8xf32>
    %97 = arith.mulf %92, %96 : vector<8x8xf32>
    %98 = arith.truncf %97 : vector<8x8xf32> to vector<8x8xbf16>
    %cst_40 = arith.constant dense<0.000000e+00> : vector<8x16xf32>
    %99 = tpu.matmul %98, %86, %cst_40 {dimension_numbers = #tpu.dot_dimension_numbers<[1], [0], [0], [1], [0, 0, 1, 1], [], []>} : vector<8x8xbf16>, vector<8x16xbf16>, vector<8x16xf32> -> vector<8x16xf32>
    %100 = vector.extract_strided_slice %68 {offsets = [8, 0], sizes = [8, 16], strides = [1, 1]} : vector<16x16xf32> to vector<8x16xf32>
    %101 = arith.truncf %100 : vector<8x16xf32> to vector<8x16xbf16>
    %102 = vector.extract_strided_slice %74 {offsets = [8, 0], sizes = [8, 16], strides = [1, 1]} : vector<16x16xf32> to vector<8x16xf32>
    %103 = arith.truncf %102 : vector<8x16xf32> to vector<8x16xbf16>
    %104 = vector.extract_strided_slice %80 {offsets = [8, 0], sizes = [8, 16], strides = [1, 1]} : vector<16x16xf32> to vector<8x16xf32>
    %105 = arith.truncf %104 : vector<8x16xf32> to vector<8x16xbf16>
    %cst_41 = arith.constant dense<0.000000e+00> : vector<8x8xf32>
    %106 = tpu.matmul %101, %103, %cst_41 {dimension_numbers = #tpu.dot_dimension_numbers<[1], [1], [0], [0], [0, 0, 1, 0], [], []>} : vector<8x16xbf16>, vector<8x16xbf16>, vector<8x8xf32> -> vector<8x8xf32>
    %cst_42 = arith.constant dense<0xFF800000> : vector<8xf32>
    %107 = vector.multi_reduction <maximumf>, %106, %cst_42 [1] : vector<8x8xf32> to vector<8xf32>
    %108 = vector.shape_cast %107 : vector<8xf32> to vector<8x1xf32>
    %109 = vector.broadcast %108 : vector<8x1xf32> to vector<8x8xf32>
    %110 = arith.subf %106, %109 : vector<8x8xf32>
    %111 = math.exp %110 : vector<8x8xf32>
    %cst_43 = arith.constant dense<0.000000e+00> : vector<8xf32>
    %112 = vector.multi_reduction <add>, %111, %cst_43 [1] : vector<8x8xf32> to vector<8xf32>
    %113 = vector.shape_cast %112 : vector<8xf32> to vector<8x1xf32>
    %114 = tpu.reciprocal %113 {approx = true} : vector<8x1xf32> -> vector<8x1xf32>
    %115 = vector.broadcast %114 : vector<8x1xf32> to vector<8x8xf32>
    %116 = arith.mulf %111, %115 : vector<8x8xf32>
    %117 = arith.truncf %116 : vector<8x8xf32> to vector<8x8xbf16>
    %cst_44 = arith.constant dense<0.000000e+00> : vector<8x16xf32>
    %118 = tpu.matmul %117, %105, %cst_44 {dimension_numbers = #tpu.dot_dimension_numbers<[1], [0], [0], [1], [0, 0, 1, 1], [], []>} : vector<8x8xbf16>, vector<8x16xbf16>, vector<8x16xf32> -> vector<8x16xf32>
    %c2 = arith.constant 2 : index
    %c0_45 = arith.constant 0 : index
    %c0_46 = arith.constant 0 : index
    %119 = vector.load %arg4[%c2, %c0_45, %c0_46] : memref<4x32x16xbf16, #tpu.memory_space<vmem>>, vector<1x32x16xbf16>
    %120 = vector.shape_cast %119 : vector<1x32x16xbf16> to vector<32x16xbf16>
    %cst_47 = arith.constant dense<0.000000e+00> : vector<16x16xf32>
    %121 = tpu.matmul %1, %120, %cst_47 {dimension_numbers = #tpu.dot_dimension_numbers<[1], [0], [0], [1], [0, 0, 1, 1], [], []>} : vector<16x32xbf16>, vector<32x16xbf16>, vector<16x16xf32> -> vector<16x16xf32>
    %122 = vector.extract_strided_slice %6 {offsets = [2, 0], sizes = [1, 16], strides = [1, 1]} : vector<12x16xf32> to vector<1x16xf32>
    %123 = vector.broadcast %122 : vector<1x16xf32> to vector<16x16xf32>
    %124 = arith.addf %121, %123 : vector<16x16xf32>
    %c2_48 = arith.constant 2 : index
    %c0_49 = arith.constant 0 : index
    %c0_50 = arith.constant 0 : index
    %125 = vector.load %arg5[%c2_48, %c0_49, %c0_50] : memref<4x32x16xbf16, #tpu.memory_space<vmem>>, vector<1x32x16xbf16>
    %126 = vector.shape_cast %125 : vector<1x32x16xbf16> to vector<32x16xbf16>
    %cst_51 = arith.constant dense<0.000000e+00> : vector<16x16xf32>
    %127 = tpu.matmul %3, %126, %cst_51 {dimension_numbers = #tpu.dot_dimension_numbers<[1], [0], [0], [1], [0, 0, 1, 1], [], []>} : vector<16x32xbf16>, vector<32x16xbf16>, vector<16x16xf32> -> vector<16x16xf32>
    %128 = vector.extract_strided_slice %6 {offsets = [6, 0], sizes = [1, 16], strides = [1, 1]} : vector<12x16xf32> to vector<1x16xf32>
    %129 = vector.broadcast %128 : vector<1x16xf32> to vector<16x16xf32>
    %130 = arith.addf %127, %129 : vector<16x16xf32>
    %c2_52 = arith.constant 2 : index
    %c0_53 = arith.constant 0 : index
    %c0_54 = arith.constant 0 : index
    %131 = vector.load %arg6[%c2_52, %c0_53, %c0_54] : memref<4x32x16xbf16, #tpu.memory_space<vmem>>, vector<1x32x16xbf16>
    %132 = vector.shape_cast %131 : vector<1x32x16xbf16> to vector<32x16xbf16>
    %cst_55 = arith.constant dense<0.000000e+00> : vector<16x16xf32>
    %133 = tpu.matmul %5, %132, %cst_55 {dimension_numbers = #tpu.dot_dimension_numbers<[1], [0], [0], [1], [0, 0, 1, 1], [], []>} : vector<16x32xbf16>, vector<32x16xbf16>, vector<16x16xf32> -> vector<16x16xf32>
    %134 = vector.extract_strided_slice %6 {offsets = [10, 0], sizes = [1, 16], strides = [1, 1]} : vector<12x16xf32> to vector<1x16xf32>
    %135 = vector.broadcast %134 : vector<1x16xf32> to vector<16x16xf32>
    %136 = arith.addf %133, %135 : vector<16x16xf32>
    %137 = vector.extract_strided_slice %124 {offsets = [0, 0], sizes = [8, 16], strides = [1, 1]} : vector<16x16xf32> to vector<8x16xf32>
    %138 = arith.truncf %137 : vector<8x16xf32> to vector<8x16xbf16>
    %139 = vector.extract_strided_slice %130 {offsets = [0, 0], sizes = [8, 16], strides = [1, 1]} : vector<16x16xf32> to vector<8x16xf32>
    %140 = arith.truncf %139 : vector<8x16xf32> to vector<8x16xbf16>
    %141 = vector.extract_strided_slice %136 {offsets = [0, 0], sizes = [8, 16], strides = [1, 1]} : vector<16x16xf32> to vector<8x16xf32>
    %142 = arith.truncf %141 : vector<8x16xf32> to vector<8x16xbf16>
    %cst_56 = arith.constant dense<0.000000e+00> : vector<8x8xf32>
    %143 = tpu.matmul %138, %140, %cst_56 {dimension_numbers = #tpu.dot_dimension_numbers<[1], [1], [0], [0], [0, 0, 1, 0], [], []>} : vector<8x16xbf16>, vector<8x16xbf16>, vector<8x8xf32> -> vector<8x8xf32>
    %cst_57 = arith.constant dense<0xFF800000> : vector<8xf32>
    %144 = vector.multi_reduction <maximumf>, %143, %cst_57 [1] : vector<8x8xf32> to vector<8xf32>
    %145 = vector.shape_cast %144 : vector<8xf32> to vector<8x1xf32>
    %146 = vector.broadcast %145 : vector<8x1xf32> to vector<8x8xf32>
    %147 = arith.subf %143, %146 : vector<8x8xf32>
    %148 = math.exp %147 : vector<8x8xf32>
    %cst_58 = arith.constant dense<0.000000e+00> : vector<8xf32>
    %149 = vector.multi_reduction <add>, %148, %cst_58 [1] : vector<8x8xf32> to vector<8xf32>
    %150 = vector.shape_cast %149 : vector<8xf32> to vector<8x1xf32>
    %151 = tpu.reciprocal %150 {approx = true} : vector<8x1xf32> -> vector<8x1xf32>
    %152 = vector.broadcast %151 : vector<8x1xf32> to vector<8x8xf32>
    %153 = arith.mulf %148, %152 : vector<8x8xf32>
    %154 = arith.truncf %153 : vector<8x8xf32> to vector<8x8xbf16>
    %cst_59 = arith.constant dense<0.000000e+00> : vector<8x16xf32>
    %155 = tpu.matmul %154, %142, %cst_59 {dimension_numbers = #tpu.dot_dimension_numbers<[1], [0], [0], [1], [0, 0, 1, 1], [], []>} : vector<8x8xbf16>, vector<8x16xbf16>, vector<8x16xf32> -> vector<8x16xf32>
    %156 = vector.extract_strided_slice %124 {offsets = [8, 0], sizes = [8, 16], strides = [1, 1]} : vector<16x16xf32> to vector<8x16xf32>
    %157 = arith.truncf %156 : vector<8x16xf32> to vector<8x16xbf16>
    %158 = vector.extract_strided_slice %130 {offsets = [8, 0], sizes = [8, 16], strides = [1, 1]} : vector<16x16xf32> to vector<8x16xf32>
    %159 = arith.truncf %158 : vector<8x16xf32> to vector<8x16xbf16>
    %160 = vector.extract_strided_slice %136 {offsets = [8, 0], sizes = [8, 16], strides = [1, 1]} : vector<16x16xf32> to vector<8x16xf32>
    %161 = arith.truncf %160 : vector<8x16xf32> to vector<8x16xbf16>
    %cst_60 = arith.constant dense<0.000000e+00> : vector<8x8xf32>
    %162 = tpu.matmul %157, %159, %cst_60 {dimension_numbers = #tpu.dot_dimension_numbers<[1], [1], [0], [0], [0, 0, 1, 0], [], []>} : vector<8x16xbf16>, vector<8x16xbf16>, vector<8x8xf32> -> vector<8x8xf32>
    %cst_61 = arith.constant dense<0xFF800000> : vector<8xf32>
    %163 = vector.multi_reduction <maximumf>, %162, %cst_61 [1] : vector<8x8xf32> to vector<8xf32>
    %164 = vector.shape_cast %163 : vector<8xf32> to vector<8x1xf32>
    %165 = vector.broadcast %164 : vector<8x1xf32> to vector<8x8xf32>
    %166 = arith.subf %162, %165 : vector<8x8xf32>
    %167 = math.exp %166 : vector<8x8xf32>
    %cst_62 = arith.constant dense<0.000000e+00> : vector<8xf32>
    %168 = vector.multi_reduction <add>, %167, %cst_62 [1] : vector<8x8xf32> to vector<8xf32>
    %169 = vector.shape_cast %168 : vector<8xf32> to vector<8x1xf32>
    %170 = tpu.reciprocal %169 {approx = true} : vector<8x1xf32> -> vector<8x1xf32>
    %171 = vector.broadcast %170 : vector<8x1xf32> to vector<8x8xf32>
    %172 = arith.mulf %167, %171 : vector<8x8xf32>
    %173 = arith.truncf %172 : vector<8x8xf32> to vector<8x8xbf16>
    %cst_63 = arith.constant dense<0.000000e+00> : vector<8x16xf32>
    %174 = tpu.matmul %173, %161, %cst_63 {dimension_numbers = #tpu.dot_dimension_numbers<[1], [0], [0], [1], [0, 0, 1, 1], [], []>} : vector<8x8xbf16>, vector<8x16xbf16>, vector<8x16xf32> -> vector<8x16xf32>
    %c3 = arith.constant 3 : index
    %c0_64 = arith.constant 0 : index
    %c0_65 = arith.constant 0 : index
    %175 = vector.load %arg4[%c3, %c0_64, %c0_65] : memref<4x32x16xbf16, #tpu.memory_space<vmem>>, vector<1x32x16xbf16>
    %176 = vector.shape_cast %175 : vector<1x32x16xbf16> to vector<32x16xbf16>
    %cst_66 = arith.constant dense<0.000000e+00> : vector<16x16xf32>
    %177 = tpu.matmul %1, %176, %cst_66 {dimension_numbers = #tpu.dot_dimension_numbers<[1], [0], [0], [1], [0, 0, 1, 1], [], []>} : vector<16x32xbf16>, vector<32x16xbf16>, vector<16x16xf32> -> vector<16x16xf32>
    %178 = vector.extract_strided_slice %6 {offsets = [3, 0], sizes = [1, 16], strides = [1, 1]} : vector<12x16xf32> to vector<1x16xf32>
    %179 = vector.broadcast %178 : vector<1x16xf32> to vector<16x16xf32>
    %180 = arith.addf %177, %179 : vector<16x16xf32>
    %c3_67 = arith.constant 3 : index
    %c0_68 = arith.constant 0 : index
    %c0_69 = arith.constant 0 : index
    %181 = vector.load %arg5[%c3_67, %c0_68, %c0_69] : memref<4x32x16xbf16, #tpu.memory_space<vmem>>, vector<1x32x16xbf16>
    %182 = vector.shape_cast %181 : vector<1x32x16xbf16> to vector<32x16xbf16>
    %cst_70 = arith.constant dense<0.000000e+00> : vector<16x16xf32>
    %183 = tpu.matmul %3, %182, %cst_70 {dimension_numbers = #tpu.dot_dimension_numbers<[1], [0], [0], [1], [0, 0, 1, 1], [], []>} : vector<16x32xbf16>, vector<32x16xbf16>, vector<16x16xf32> -> vector<16x16xf32>
    %184 = vector.extract_strided_slice %6 {offsets = [7, 0], sizes = [1, 16], strides = [1, 1]} : vector<12x16xf32> to vector<1x16xf32>
    %185 = vector.broadcast %184 : vector<1x16xf32> to vector<16x16xf32>
    %186 = arith.addf %183, %185 : vector<16x16xf32>
    %c3_71 = arith.constant 3 : index
    %c0_72 = arith.constant 0 : index
    %c0_73 = arith.constant 0 : index
    %187 = vector.load %arg6[%c3_71, %c0_72, %c0_73] : memref<4x32x16xbf16, #tpu.memory_space<vmem>>, vector<1x32x16xbf16>
    %188 = vector.shape_cast %187 : vector<1x32x16xbf16> to vector<32x16xbf16>
    %cst_74 = arith.constant dense<0.000000e+00> : vector<16x16xf32>
    %189 = tpu.matmul %5, %188, %cst_74 {dimension_numbers = #tpu.dot_dimension_numbers<[1], [0], [0], [1], [0, 0, 1, 1], [], []>} : vector<16x32xbf16>, vector<32x16xbf16>, vector<16x16xf32> -> vector<16x16xf32>
    %190 = vector.extract_strided_slice %6 {offsets = [11, 0], sizes = [1, 16], strides = [1, 1]} : vector<12x16xf32> to vector<1x16xf32>
    %191 = vector.broadcast %190 : vector<1x16xf32> to vector<16x16xf32>
    %192 = arith.addf %189, %191 : vector<16x16xf32>
    %193 = vector.extract_strided_slice %180 {offsets = [0, 0], sizes = [8, 16], strides = [1, 1]} : vector<16x16xf32> to vector<8x16xf32>
    %194 = arith.truncf %193 : vector<8x16xf32> to vector<8x16xbf16>
    %195 = vector.extract_strided_slice %186 {offsets = [0, 0], sizes = [8, 16], strides = [1, 1]} : vector<16x16xf32> to vector<8x16xf32>
    %196 = arith.truncf %195 : vector<8x16xf32> to vector<8x16xbf16>
    %197 = vector.extract_strided_slice %192 {offsets = [0, 0], sizes = [8, 16], strides = [1, 1]} : vector<16x16xf32> to vector<8x16xf32>
    %198 = arith.truncf %197 : vector<8x16xf32> to vector<8x16xbf16>
    %cst_75 = arith.constant dense<0.000000e+00> : vector<8x8xf32>
    %199 = tpu.matmul %194, %196, %cst_75 {dimension_numbers = #tpu.dot_dimension_numbers<[1], [1], [0], [0], [0, 0, 1, 0], [], []>} : vector<8x16xbf16>, vector<8x16xbf16>, vector<8x8xf32> -> vector<8x8xf32>
    %cst_76 = arith.constant dense<0xFF800000> : vector<8xf32>
    %200 = vector.multi_reduction <maximumf>, %199, %cst_76 [1] : vector<8x8xf32> to vector<8xf32>
    %201 = vector.shape_cast %200 : vector<8xf32> to vector<8x1xf32>
    %202 = vector.broadcast %201 : vector<8x1xf32> to vector<8x8xf32>
    %203 = arith.subf %199, %202 : vector<8x8xf32>
    %204 = math.exp %203 : vector<8x8xf32>
    %cst_77 = arith.constant dense<0.000000e+00> : vector<8xf32>
    %205 = vector.multi_reduction <add>, %204, %cst_77 [1] : vector<8x8xf32> to vector<8xf32>
    %206 = vector.shape_cast %205 : vector<8xf32> to vector<8x1xf32>
    %207 = tpu.reciprocal %206 {approx = true} : vector<8x1xf32> -> vector<8x1xf32>
    %208 = vector.broadcast %207 : vector<8x1xf32> to vector<8x8xf32>
    %209 = arith.mulf %204, %208 : vector<8x8xf32>
    %210 = arith.truncf %209 : vector<8x8xf32> to vector<8x8xbf16>
    %cst_78 = arith.constant dense<0.000000e+00> : vector<8x16xf32>
    %211 = tpu.matmul %210, %198, %cst_78 {dimension_numbers = #tpu.dot_dimension_numbers<[1], [0], [0], [1], [0, 0, 1, 1], [], []>} : vector<8x8xbf16>, vector<8x16xbf16>, vector<8x16xf32> -> vector<8x16xf32>
    %212 = vector.extract_strided_slice %180 {offsets = [8, 0], sizes = [8, 16], strides = [1, 1]} : vector<16x16xf32> to vector<8x16xf32>
    %213 = arith.truncf %212 : vector<8x16xf32> to vector<8x16xbf16>
    %214 = vector.extract_strided_slice %186 {offsets = [8, 0], sizes = [8, 16], strides = [1, 1]} : vector<16x16xf32> to vector<8x16xf32>
    %215 = arith.truncf %214 : vector<8x16xf32> to vector<8x16xbf16>
    %216 = vector.extract_strided_slice %192 {offsets = [8, 0], sizes = [8, 16], strides = [1, 1]} : vector<16x16xf32> to vector<8x16xf32>
    %217 = arith.truncf %216 : vector<8x16xf32> to vector<8x16xbf16>
    %cst_79 = arith.constant dense<0.000000e+00> : vector<8x8xf32>
    %218 = tpu.matmul %213, %215, %cst_79 {dimension_numbers = #tpu.dot_dimension_numbers<[1], [1], [0], [0], [0, 0, 1, 0], [], []>} : vector<8x16xbf16>, vector<8x16xbf16>, vector<8x8xf32> -> vector<8x8xf32>
    %cst_80 = arith.constant dense<0xFF800000> : vector<8xf32>
    %219 = vector.multi_reduction <maximumf>, %218, %cst_80 [1] : vector<8x8xf32> to vector<8xf32>
    %220 = vector.shape_cast %219 : vector<8xf32> to vector<8x1xf32>
    %221 = vector.broadcast %220 : vector<8x1xf32> to vector<8x8xf32>
    %222 = arith.subf %218, %221 : vector<8x8xf32>
    %223 = math.exp %222 : vector<8x8xf32>
    %cst_81 = arith.constant dense<0.000000e+00> : vector<8xf32>
    %224 = vector.multi_reduction <add>, %223, %cst_81 [1] : vector<8x8xf32> to vector<8xf32>
    %225 = vector.shape_cast %224 : vector<8xf32> to vector<8x1xf32>
    %226 = tpu.reciprocal %225 {approx = true} : vector<8x1xf32> -> vector<8x1xf32>
    %227 = vector.broadcast %226 : vector<8x1xf32> to vector<8x8xf32>
    %228 = arith.mulf %223, %227 : vector<8x8xf32>
    %229 = arith.truncf %228 : vector<8x8xf32> to vector<8x8xbf16>
    %cst_82 = arith.constant dense<0.000000e+00> : vector<8x16xf32>
    %230 = tpu.matmul %229, %217, %cst_82 {dimension_numbers = #tpu.dot_dimension_numbers<[1], [0], [0], [1], [0, 0, 1, 1], [], []>} : vector<8x8xbf16>, vector<8x16xbf16>, vector<8x16xf32> -> vector<8x16xf32>
    %231 = tpu.concatenate %43, %99, %155, %211 in 1 : vector<8x16xf32>, vector<8x16xf32>, vector<8x16xf32>, vector<8x16xf32> -> vector<8x64xf32>
    %232 = tpu.concatenate %62, %118, %174, %230 in 1 : vector<8x16xf32>, vector<8x16xf32>, vector<8x16xf32>, vector<8x16xf32> -> vector<8x64xf32>
    %233 = tpu.concatenate %231, %232 in 0 : vector<8x64xf32>, vector<8x64xf32> -> vector<16x64xf32>
    %234 = arith.truncf %233 : vector<16x64xf32> to vector<16x64xbf16>
    %c0_83 = arith.constant 0 : index
    %c0_84 = arith.constant 0 : index
    %235 = vector.load %arg7[%c0_83, %c0_84] : memref<64x32xbf16, #tpu.memory_space<vmem>>, vector<64x32xbf16>
    %cst_85 = arith.constant dense<0.000000e+00> : vector<16x32xf32>
    %236 = tpu.matmul %234, %235, %cst_85 {dimension_numbers = #tpu.dot_dimension_numbers<[1], [0], [0], [1], [0, 0, 1, 1], [], []>} : vector<16x64xbf16>, vector<64x32xbf16>, vector<16x32xf32> -> vector<16x32xf32>
    %c0_86 = arith.constant 0 : index
    %c0_87 = arith.constant 0 : index
    %237 = vector.load %arg9[%c0_86, %c0_87] : memref<1x32xf32, #tpu.memory_space<vmem>>, vector<1x32xf32>
    %238 = vector.broadcast %237 : vector<1x32xf32> to vector<16x32xf32>
    %239 = arith.addf %236, %238 : vector<16x32xf32>
    %c0_88 = arith.constant 0 : index
    %c0_89 = arith.constant 0 : index
    %240 = vector.load %arg10[%c0_88, %c0_89] : memref<16x32xf32, #tpu.memory_space<vmem>>, vector<16x32xf32>
    tpu.vector_store %arg10[%c0_88, %c0_89], %239 {strides = array<i32>} : memref<16x32xf32, #tpu.memory_space<vmem>>, vector<16x32xf32>,
    return
  }
  func.func @transform_0(%arg0: i32) -> (i32, i32) {
    %c0_i32 = arith.constant 0 : i32
    %c0_i32_0 = arith.constant 0 : i32
    %c0_i32_1 = arith.constant 0 : i32
    return %c0_i32, %c0_i32_0 : i32, i32
  }
  func.func @transform_1(%arg0: i32) -> (i32, i32) {
    %c0_i32 = arith.constant 0 : i32
    %c0_i32_0 = arith.constant 0 : i32
    %c0_i32_1 = arith.constant 0 : i32
    return %c0_i32, %c0_i32_0 : i32, i32
  }
  func.func @transform_2(%arg0: i32) -> (i32, i32) {
    %c0_i32 = arith.constant 0 : i32
    %c0_i32_0 = arith.constant 0 : i32
    %c0_i32_1 = arith.constant 0 : i32
    return %c0_i32, %c0_i32_0 : i32, i32
  }
  func.func @transform_3(%arg0: i32) -> (i32, i32, i32) {
    %c0_i32 = arith.constant 0 : i32
    %c0_i32_0 = arith.constant 0 : i32
    %c0_i32_1 = arith.constant 0 : i32
    %c0_i32_2 = arith.constant 0 : i32
    return %c0_i32, %c0_i32_0, %c0_i32_1 : i32, i32, i32
  }
  func.func @transform_4(%arg0: i32) -> (i32, i32, i32) {
    %c0_i32 = arith.constant 0 : i32
    %c0_i32_0 = arith.constant 0 : i32
    %c0_i32_1 = arith.constant 0 : i32
    %c0_i32_2 = arith.constant 0 : i32
    return %c0_i32, %c0_i32_0, %c0_i32_1 : i32, i32, i32
  }
  func.func @transform_5(%arg0: i32) -> (i32, i32, i32) {
    %c0_i32 = arith.constant 0 : i32
    %c0_i32_0 = arith.constant 0 : i32
    %c0_i32_1 = arith.constant 0 : i32
    %c0_i32_2 = arith.constant 0 : i32
    return %c0_i32, %c0_i32_0, %c0_i32_1 : i32, i32, i32
  }
  func.func @transform_6(%arg0: i32) -> (i32, i32) {
    %c0_i32 = arith.constant 0 : i32
    %c0_i32_0 = arith.constant 0 : i32
    %c0_i32_1 = arith.constant 0 : i32
    return %c0_i32, %c0_i32_0 : i32, i32
  }
  func.func @transform_7(%arg0: i32) -> (i32, i32) {
    %c0_i32 = arith.constant 0 : i32
    %c0_i32_0 = arith.constant 0 : i32
    %c0_i32_1 = arith.constant 0 : i32
    return %c0_i32, %c0_i32_0 : i32, i32
  }
  func.func @transform_8(%arg0: i32) -> (i32, i32) {
    %c0_i32 = arith.constant 0 : i32
    %c0_i32_0 = arith.constant 0 : i32
    %c0_i32_1 = arith.constant 0 : i32
    return %c0_i32, %c0_i32_0 : i32, i32
  }
  func.func @transform_9(%arg0: i32) -> (i32, i32) {
    %c0_i32 = arith.constant 0 : i32
    %c0_i32_0 = arith.constant 0 : i32
    %c0_i32_1 = arith.constant 0 : i32
    return %c0_i32, %c0_i32_0 : i32, i32
  }
}

</mosaic_0001>

<bundles_post_ra>
// kernel: tpu_custom_call.1
= control target key start
LH: loop header
LB: loop body
LE: loop exit
PB: predicated region body
PF: predicated region fallthrough
CT: control target
= control target key end

     0   :  { %v2265_v1 = vmov 0.0   ;;  %vm2266_vm0 = vmmov 0   ;;  %vm65_vm1 = vcmask 261120   ;;  %s2673_s0 = inlined_call_operand.vmem [shape: f32[16,32], index: 0, kind: input, shape index: {}]   ;;  %s2674_s1 = inlined_call_operand.vmem [shape: f32[16,32], index: 1, kind: input, shape index: {}]   ;;  %s2675_s2 = inlined_call_operand.vmem [shape: f32[16,32], index: 2, kind: input, shape index: {}]   ;;  %s2676_s3 = inlined_call_operand.vmem [shape: bf16[4,32,16], index: 3, kind: input, shape index: {}]   ;;  %s2677_s4 = inlined_call_operand.vmem [shape: bf16[4,32,16], index: 4, kind: input, shape index: {}]   ;;  %s2678_s5 = inlined_call_operand.vmem [shape: bf16[4,32,16], index: 5, kind: input, shape index: {}]   ;;  %s2679_s6 = inlined_call_operand.vmem [shape: bf16[64,32], index: 6, kind: input, shape index: {}]   ;;  %s2680_s7 = inlined_call_operand.vmem [shape: f32[12,16], index: 7, kind: input, shape index: {}]   ;;  %s2681_s8 = inlined_call_operand.vmem [shape: f32[1,32], index: 8, kind: input, shape index: {}]   ;;  %s2682_s9 = inlined_call_operand.hbm [shape: f32[16,32], index: 9, kind: output, shape index: {}]  }
   0x1   :  { %v2183_v0 = vld [vmem:[%s2676_s3 + $0x8] sm:$0xff]   ;;  %1956 = vmatprep.subr.bf16.mxu1 %v2265_v1  ;;  %v2184_v2 = vld [vmem:[%s2676_s3] sm:$0xff]   ;;  %1972 = vmatprep.subr.bf16.mxu0 %v2265_v1 }
   0x2   :  { %1957 = vmatpush3.bf16.msra.mxu1 %v2183_v0  ;;  %1960 = vmatprep.mubr.msk.bf16.mxu1 %vm2266_vm0, %v2265_v1  ;;  %v34_v3 = vld [vmem:[%s2673_s0] sm:$0xff]  ;;  %v35_v4 = vld [vmem:[%s2673_s0 + $0x8] sm:$0xff] }
   0x3   :  { %1958 = vmatprep.subr.bf16.mxu1 %v2265_v1  ;;  %1976 = vmatprep.mubr.msk.bf16.mxu0 %vm2266_vm0, %v2265_v1  ;;  %v2342_v5 = vpack.c.bf16 %v35_v4, %v34_v3  ;;  %v2185_v6 = vld [vmem:[%s2677_s4 + $0x8] sm:$0xff]   ;;  %v2186_v7 = vld [vmem:[%s2677_s4] sm:$0xff]  }
   0x4   :  { %v37_v8 = vld [vmem:[%s2674_s1] sm:$0xff]  ;;  %v38_v9 = vld [vmem:[%s2674_s1 + $0x8] sm:$0xff] }
   0x5   :  { %v2362_v10 = vpack.c.bf16 %v38_v9, %v37_v8 }
   0x6   :  { %1959 = vmatpush3.bf16.msra.mxu1 %v2184_v2 }
   0x7   :  { %1964 = vmatprep.subr.bf16.mxu1 %v2265_v1 }
   0x9   :  { %1961 = vmatmul.mubr.msk.bf16.vlgmr.msra.gmra.mxu1 %vm65_vm1, %v2342_v5 }
   0xa   :  { %1965 = vmatpush3.bf16.msra.mxu1 %v2185_v6  ;;  %1968 = vmatprep.mubr.msk.bf16.mxu1 %vm2266_vm0, %v2265_v1 }
   0xb   :  { %1966 = vmatprep.subr.bf16.mxu1 %v2265_v1 }
   0xe   :  { %1967 = vmatpush3.bf16.msra.mxu1 %v2186_v7 }
   0xf   :  { %1980 = vmatprep.subr.bf16.mxu1 %v2265_v1 }
  0x11   :  { %1969 = vmatmul.mubr.msk.bf16.vlgmr.msra.gmra.mxu1 %vm65_vm1, %v2362_v10 }
  0x12   :  { %1982 = vmatprep.mubr.msk.bf16.mxu1 %vm2266_vm0, %v2265_v1 }
  0x13   :  { %14 = vsyncpa [#allocation3], 0  ;;  %v49_v11 = vlaneseq  ;;  %v2375_v16 = vld [vmem:[%s2680_s7] sm:$0xff]  ;;  %vm241_vm2 = vcmask 130048   ;;  %v2187_v36 = vld [vmem:[%s2678_s5 + $0x8] sm:$0xff]   ;;  %vm288_vm3 = vcmask 64512  }
  0x14   :  { %1973 = vmatpush3.bf16.msra.mxu0 %v2187_v36  ;;  %v2188_v37 = vld [vmem:[%s2678_s5] sm:$0xff]   ;;  %v41_v39 = vld [vmem:[%s2675_s2 + $0x8] sm:$0xff]  ;;  %vm304_vm4 = vcmask 1043456   ;;  %v2190_v8 = vld [vmem:[%s2676_s3 + $0x18] sm:$0xff]   ;;  %s2268_s0 = smov 32   ;;  %s2269_s28 = smov 48  }
  0x15   :  { %v2369_v12 = vshrl.u32 %v49_v11, 7  ;;  %v40_v38 = vld [vmem:[%s2675_s2] sm:$0xff]  ;;  %1974 = vmatprep.subr.bf16.mxu0 %v2265_v1  ;;  %v2415_v51 = vld [vmem:[%s2680_s7 + $0x8] sm:$0xf]  ;;  %v2192_v9 = vld [vmem:[%s2676_s3 + $0x10] sm:$0xff]   ;;  %vm1669_vm5 = vcmask 392192  }
  0x16   :  { %v2403_v40 = vpack.c.bf16 %v41_v39, %v40_v38  ;;  %vm1726_vm6 = vcmask 523264   ;;  %s2270_s30 = smov [#allocation2]  }
  0x17   :  { %v116_v14 = vsub.s32 4, %v2369_v12  ;;  %v51_v20 = vsub.s32 0, %v2369_v12  ;;  %v462_v39 = vsub.s32 1, %v2369_v12  ;;  %s1778_s10 = sshll.u32 %s2270_s30, 4  ;;  %s1779_s10 = int_to_ptr.vmem [resolvable:$true] %s1778_s10 }
  0x18   :  { %1975 = vmatpush3.bf16.msra.mxu0 %v2188_v37  ;;  %s2243_s11 = scalar_lea.vmem %s1779_s10, 256  ;;  %p2248_p1 = scmp.lt.s32.totalorder %s1779_s10, %s1779_s10 }
  0x19   :  { %v117_v18 = vrot.slane %v2375_v16, %v116_v14  ;;  %v52_v24 = vrot.slane %v2375_v16, %v51_v20  ;;  %1986 = vmatprep.subr.bf16.mxu0 %v2265_v1  ;;  %v181_v52 = vrot.slane %v2415_v51, %v51_v20  ;;  %p2244_p0 = scmp.ne.s32.totalorder %s1779_s10, %s2243_s11  ;;  %p2249_p2 = scmp.lt.s32.totalorder %s2243_s11, %s2243_s11 }
  0x1b   :  { %1977 = vmatmul.mubr.msk.bf16.vlgmr.msra.gmra.mxu0 %vm65_vm1, %v2403_v40  ;;  %p2250_p3 = por %p2249_p2, %p2248_p1 }
  0x1c   :  { %1988 = vmatprep.mubr.msk.bf16.mxu0 %vm2266_vm0, %v2265_v1 }
  0x1d   :  { %p2251_p4 = pnand %p2250_p3, %p2244_p0 }
  0xc9   :  { %v103_v13 = vpop.f32.mrf.mxu1 }
  0xca   :  { %v104_v30 = vadd.f32 %v103_v13, %v52_v24 }
  0xcb   :  { %v1962_v15 = vpop.f32.mrf.mxu1 }
  0xcc   :  { %v238_v32 = vpack.c.bf16 %v104_v30, %v104_v30 }
  0xcd   :  { %v106_v17 = vpop.f32.mrf.mxu1 }
  0xce   :  { %v107_v34 = vadd.f32 %v106_v17, %v52_v24 }
  0xcf   :  { %v1963_v19 = vpop.f32.mrf.mxu1 }
  0xd0   :  { %v348_v35 = vpack.c.bf16 %v107_v34, %v107_v34 }
  0xd1   :  { %v167_v21 = vpop.f32.mrf.mxu1 }
  0xd2   :  { %v168_v22 = vadd.f32 %v167_v21, %v117_v18 }
  0xd3   :  { %v1970_v23 = vpop.f32.mrf.mxu1 }
  0xd4   :  { %v239_v25 = vpack.c.bf16 %v168_v22, %v168_v22  ;;  %v2189_v23 = vld [vmem:[%s2677_s4 + $0x18] sm:$0xff]  }
  0xd5   :  { %v170_v26 = vpop.f32.mrf.mxu1 }
  0xd6   :  { %v246_v27 = vsel %vm241_vm2, %v239_v25, 0  ;;  %v171_v28 = vadd.f32 %v170_v26, %v117_v18  ;;  %v2191_v25 = vld [vmem:[%s2677_s4 + $0x10] sm:$0xff]  }
  0xd7   :  { %v1971_v29 = vpop.f32.mrf.mxu1  ;;  %1981 = vmatpush3.bf16.xpose.msra.mxu1 %v246_v27 }
  0xd8   :  { %1992 = vmatprep.subr.bf16.mxu1 %v2265_v1  ;;  %v349_v31 = vpack.c.bf16 %v171_v28, %v171_v28 }
  0xda   :  { %v355_v33 = vsel %vm241_vm2, %v349_v31, 0 }
  0xdb   :  { %v231_v53 = vpop.f32.mrf.mxu0 }
  0xdc   :  { %v232_v54 = vadd.f32 %v231_v53, %v181_v52 }
  0xdd   :  { %v1978_v55 = vpop.f32.mrf.mxu0 }
  0xde   :  { %1983 = vmatmul.mubr.msk.bf16.vlgmr.msra.gmra.mxu1 %vm241_vm2, %v238_v32  ;;  %v240_v56 = vpack.c.bf16 %v232_v54, %v232_v54 }
  0xdf   :  { %1993 = vmatpush3.bf16.xpose.msra.mxu1 %v355_v33  ;;  %1994 = vmatprep.mubr.msk.bf16.mxu1 %vm2266_vm0, %v2265_v1  ;;  %v234_v6 = vpop.f32.mrf.mxu0 }
  0xe0   :  { %2004 = vmatprep.subr.bf16.mxu1 %v2265_v1  ;;  %v306_v57 = vsel %vm304_vm4, %v240_v56, 0  ;;  %v235_v14 = vadd.f32 %v234_v6, %v181_v52 }
  0xe1   :  { %1987 = vmatpush3.bf16.msra.mxu0 %v306_v57  ;;  %v1979_v7 = vpop.f32.mrf.mxu0 }
  0xe2   :  { %1998 = vmatprep.subr.bf16.mxu0 %v2265_v1  ;;  %v350_v17 = vpack.c.bf16 %v235_v14, %v235_v14 }
  0xe4   :  { %v413_v20 = vsel %vm304_vm4, %v350_v17, 0 }
  0xe6   :  { %1995 = vmatmul.mubr.msk.bf16.vlgmr.msra.gmra.mxu1 %vm241_vm2, %v348_v35  ;;  %v524_v35 = vsub.s32 5, %v2369_v12 }
  0xe7   :  { %2008 = vmatprep.mubr.msk.bf16.mxu1 %vm2266_vm0, %v2265_v1  ;;  %2005 = vmatpush3.bf16.msra.mxu1 %v2190_v8 }
  0xe8   :  { %2006 = vmatprep.subr.bf16.mxu1 %v2265_v1  ;;  %v525_v38 = vrot.slane %v2375_v16, %v524_v35 }
  0xeb   :  { %2007 = vmatpush3.bf16.msra.mxu1 %v2192_v9 }
  0xec   :  { %2020 = vmatprep.subr.bf16.mxu1 %v2265_v1 }
  0xee   :  { %2009 = vmatmul.mubr.msk.bf16.vlgmr.msra.gmra.mxu1 %vm65_vm1, %v2342_v5 }
  0xef   :  { %2024 = vmatprep.mubr.msk.bf16.mxu1 %vm2266_vm0, %v2265_v1 }
 0x19e   :  { %v282_v41 = vpop.f32.mrf.mxu1 }
 0x19f   :  { %v289_v42 = vsel %vm288_vm3, %v282_v41, -inf }
 0x1a0   :  { %290 = vmax.xlane.f32.xlu0 %v289_v42  ;;  %v1984_v43 = vpop.f32.mrf.mxu1 }
 0x1a2   :  { %v285_v44 = vpop.f32.mrf.mxu1 }
 0x1a3   :  { %v463_v44 = vrot.slane %v2375_v16, %v462_v39 }
 0x1a4   :  { %v1985_v45 = vpop.f32.mrf.mxu1 }
 0x1a6   :  { %v391_v46 = vpop.f32.mrf.mxu1 }
 0x1a7   :  { %v397_v47 = vsel %vm288_vm3, %v391_v46, -inf }
 0x1a8   :  { %398 = vmax.xlane.f32.xlu0 %v397_v47  ;;  %v1996_v48 = vpop.f32.mrf.mxu1 }
 0x1aa   :  { %v394_v49 = vpop.f32.mrf.mxu1 }
 0x1ac   :  { %v1997_v50 = vpop.f32.mrf.mxu1 }
 0x1ae   :  { %v510_v26 = vpop.f32.mrf.mxu1 }
 0x1af   :  { %v511_v49 = vadd.f32 %v510_v26, %v463_v44 }
 0x1b0   :  { %v2010_v27 = vpop.f32.mrf.mxu1 }
 0x1b1   :  { %v641_v53 = vpack.c.bf16 %v511_v49, %v511_v49 }
 0x1b2   :  { %v513_v28 = vpop.f32.mrf.mxu1 }
 0x1b3   :  { %v514_v56 = vadd.f32 %v513_v28, %v463_v44  ;;  %v2195_v44 = vld [vmem:[%s2677_s4 + $0x28] sm:$0xff]  }
 0x1b4   :  { %v2011_v29 = vpop.f32.mrf.mxu1 }
 0x1b5   :  { %v748_v57 = vpack.c.bf16 %v514_v56, %v514_v56 }
 0x229   :  { %v291_v58 = vpop.xlane.xlu0 %290 }
 0x22a   :  { %v292_v59 = vsub.f32 %v282_v41, %v291_v58  ;;  %v2193_v58 = vld [vmem:[%s2678_s5 + $0x18] sm:$0xff]  }
 0x22b   :  { %2021 = vmatpush3.bf16.msra.mxu1 %v2193_v58  ;;  %v924_v58 = vsub.s32 6, %v2369_v12 }
 0x22c   :  { %v293_v60 = vmul.f32 1.442695, %v292_v59  ;;  %v2194_v59 = vld [vmem:[%s2678_s5 + $0x10] sm:$0xff]   ;;  %2022 = vmatprep.subr.bf16.mxu1 %v2265_v1 }
 0x22e   :  { %2211 = vpow2.f32 %v293_v60 }
 0x22f   :  { %2023 = vmatpush3.bf16.msra.mxu1 %v2194_v59 }
 0x230   :  { %2034 = vmatprep.subr.bf16.mxu1 %v2265_v1 }
 0x231   :  { %v399_v61 = vpop.xlane.xlu0 %398 }
 0x232   :  { %v400_v62 = vsub.f32 %v391_v46, %v399_v61  ;;  %2025 = vmatmul.mubr.msk.bf16.vlgmr.msra.gmra.mxu1 %vm65_vm1, %v2403_v40 }
 0x233   :  { %2036 = vmatprep.mubr.msk.bf16.mxu1 %vm2266_vm0, %v2265_v1 }
 0x234   :  { %v401_v63 = vmul.f32 1.442695, %v400_v62 }
 0x236   :  { %2213 = vpow2.f32 %v401_v63 }
 0x23b   :  { %v2212_v0 = vpop.eup %2211 }
 0x23c   :  { %v295_v2 = vsel %vm288_vm3, %v2212_v0, 0.0 }
 0x23d   :  { %296 = vadd.xlane.f32.xlu1 %v295_v2 }
 0x243   :  { %v2214_v3 = vpop.eup %2213 }
 0x244   :  { %v403_v4 = vsel %vm288_vm3, %v2214_v3, 0.0 }
 0x245   :  { %404 = vadd.xlane.f32.xlu1 %v403_v4 }
 0x2c6   :  { %v297_v11 = vpop.xlane.xlu1 %296 }
 0x2c7   :  { %2215 = vrcp.f32 %v297_v11 }
 0x2ce   :  { %v405_v13 = vpop.xlane.xlu1 %404 }
 0x2cf   :  { %2217 = vrcp.f32 %v405_v13 }
 0x2d4   :  { %v2216_v15 = vpop.eup %2215 }
 0x2d5   :  { %v299_v18 = vmul.f32 %v2216_v15, %v2212_v0 }
 0x2d7   :  { %v300_v19 = vpack.c.bf16 %v299_v18, %v299_v18 }
 0x2d9   :  { %1989 = vmatmul.mubr.msk.bf16.vlgmr.msra.gmra.mxu0 %vm288_vm3, %v300_v19 }
 0x2da   :  { %1999 = vmatpush3.bf16.msra.mxu0 %v413_v20  ;;  %2000 = vmatprep.mubr.msk.bf16.mxu0 %vm2266_vm0, %v2265_v1 }
 0x2db   :  { %2012 = vmatprep.subr.bf16.mxu0 %v2265_v1 }
 0x2dc   :  { %v2218_v21 = vpop.eup %2217 }
 0x2dd   :  { %v407_v22 = vmul.f32 %v2218_v21, %v2214_v3  ;;  %v587_v21 = vrot.slane %v2415_v51, %v462_v39 }
 0x2df   :  { %v408_v24 = vpack.c.bf16 %v407_v22, %v407_v22 }
 0x2e1   :  { %2001 = vmatmul.mubr.msk.bf16.vlgmr.msra.gmra.mxu0 %vm288_vm3, %v408_v24 }
 0x2e2   :  { %2013 = vmatpush3.bf16.msra.mxu0 %v2189_v23  ;;  %2016 = vmatprep.mubr.msk.bf16.mxu0 %vm2266_vm0, %v2265_v1 }
 0x2e3   :  { %2014 = vmatprep.subr.bf16.mxu0 %v2265_v1 }
 0x2e6   :  { %2015 = vmatpush3.bf16.msra.mxu0 %v2191_v25 }
 0x2e7   :  { %2028 = vmatprep.subr.bf16.mxu0 %v2265_v1 }
 0x2e9   :  { %2017 = vmatmul.mubr.msk.bf16.vlgmr.msra.gmra.mxu0 %vm65_vm1, %v2362_v10 }
 0x2ea   :  { %2030 = vmatprep.mubr.msk.bf16.mxu0 %vm2266_vm0, %v2265_v1 }
 0x2f2   :  { %v634_v22 = vpop.f32.mrf.mxu1 }
 0x2f3   :  { %v635_v23 = vadd.f32 %v634_v22, %v587_v21 }
 0x2f4   :  { %v2026_v24 = vpop.f32.mrf.mxu1 }
 0x2f5   :  { %v643_v25 = vpack.c.bf16 %v635_v23, %v635_v23 }
 0x2f6   :  { %v637_v26 = vpop.f32.mrf.mxu1 }
 0x2f7   :  { %v638_v27 = vadd.f32 %v637_v26, %v587_v21  ;;  %v706_v28 = vsel %vm304_vm4, %v643_v25, 0  ;;  %v2200_v21 = vld [vmem:[%s2678_s5 + $0x20] sm:$0xff]  }
 0x2f8   :  { %v2027_v29 = vpop.f32.mrf.mxu1  ;;  %2035 = vmatpush3.bf16.msra.mxu1 %v706_v28 }
 0x2f9   :  { %2046 = vmatprep.subr.bf16.mxu1 %v2265_v1 }
 0x399   :  { %v2454_v30 = vpop.f32.mrf.mxu0 }
 0x39b   :  { %v1990_v31 = vpop.f32.mrf.mxu0 }
 0x39c   :  { %v2196_v31 = vld [vmem:[%s2676_s3 + $0x28] sm:$0xff]  }
 0x39d   :  { %v345_v32 = vpop.f32.mrf.mxu0 }
 0x39e   :  { %v2198_v32 = vld [vmem:[%s2676_s3 + $0x20] sm:$0xff]  }
 0x39f   :  { %v1991_v33 = vpop.f32.mrf.mxu0 }
 0x3a1   :  { %v2456_v34 = vpop.f32.mrf.mxu0 }
 0x3a3   :  { %v2002_v36 = vpop.f32.mrf.mxu0 }
 0x3a5   :  { %v452_v37 = vpop.f32.mrf.mxu0 }
 0x3a6   :  { %v750_v37 = vpack.c.bf16 %v638_v27, %v638_v27 }
 0x3a7   :  { %v2003_v41 = vpop.f32.mrf.mxu0 }
 0x3a8   :  { %v813_v41 = vsel %vm304_vm4, %v750_v37, 0 }
 0x3a9   :  { %v572_v42 = vpop.f32.mrf.mxu0 }
 0x3aa   :  { %v573_v43 = vadd.f32 %v572_v42, %v525_v38 }
 0x3ab   :  { %v2018_v45 = vpop.f32.mrf.mxu0 }
 0x3ac   :  { %v642_v46 = vpack.c.bf16 %v573_v43, %v573_v43 }
 0x3ad   :  { %v575_v47 = vpop.f32.mrf.mxu0 }
 0x3ae   :  { %v648_v48 = vsel %vm241_vm2, %v642_v46, 0  ;;  %v576_v50 = vadd.f32 %v575_v47, %v525_v38  ;;  %v2197_v46 = vld [vmem:[%s2677_s4 + $0x20] sm:$0xff]  }
 0x3af   :  { %v2019_v52 = vpop.f32.mrf.mxu0  ;;  %2029 = vmatpush3.bf16.xpose.msra.mxu0 %v648_v48 }
 0x3b0   :  { %2040 = vmatprep.subr.bf16.mxu0 %v2265_v1  ;;  %v749_v54 = vpack.c.bf16 %v576_v50, %v576_v50 }
 0x3b2   :  { %v755_v55 = vsel %vm241_vm2, %v749_v54, 0 }
 0x3b6   :  { %2031 = vmatmul.mubr.msk.bf16.vlgmr.msra.gmra.mxu0 %vm241_vm2, %v641_v53 }
 0x3b7   :  { %2041 = vmatpush3.bf16.xpose.msra.mxu0 %v755_v55  ;;  %2042 = vmatprep.mubr.msk.bf16.mxu0 %vm2266_vm0, %v2265_v1 }
 0x3b8   :  { %2052 = vmatprep.subr.bf16.mxu0 %v2265_v1 }
 0x3be   :  { %2043 = vmatmul.mubr.msk.bf16.vlgmr.msra.gmra.mxu0 %vm241_vm2, %v748_v57 }
 0x3bf   :  { %2056 = vmatprep.mubr.msk.bf16.mxu0 %vm2266_vm0, %v2265_v1  ;;  %2053 = vmatpush3.bf16.msra.mxu0 %v2196_v31 }
 0x3c0   :  { %2054 = vmatprep.subr.bf16.mxu0 %v2265_v1 }
 0x3c3   :  { %2055 = vmatpush3.bf16.msra.mxu0 %v2198_v32 }
 0x3c4   :  { %2068 = vmatprep.subr.bf16.mxu0 %v2265_v1 }
 0x3c6   :  { %2057 = vmatmul.mubr.msk.bf16.vlgmr.msra.gmra.mxu0 %vm65_vm1, %v2342_v5 }
 0x3c7   :  { %2072 = vmatprep.mubr.msk.bf16.mxu0 %vm2266_vm0, %v2265_v1 }
 0x476   :  { %v684_v60 = vpop.f32.mrf.mxu0 }
 0x477   :  { %v690_v61 = vsel %vm288_vm3, %v684_v60, -inf }
 0x478   :  { %691 = vmax.xlane.f32.xlu0 %v690_v61  ;;  %v2032_v62 = vpop.f32.mrf.mxu0  ;;  %v925_v61 = vrot.slane %v2375_v16, %v924_v58  ;;  %v2204_v58 = vld [vmem:[%s2676_s3 + $0x30] sm:$0xff]  }
 0x479   :  { %v862_v62 = vsub.s32 2, %v2369_v12 }
 0x47a   :  { %v687_v63 = vpop.f32.mrf.mxu0 }
 0x47c   :  { %v2033_v0 = vpop.f32.mrf.mxu0 }
 0x47e   :  { %v791_v2 = vpop.f32.mrf.mxu0 }
 0x47f   :  { %v797_v3 = vsel %vm288_vm3, %v791_v2, -inf }
 0x480   :  { %798 = vmax.xlane.f32.xlu1 %v797_v3  ;;  %v2044_v4 = vpop.f32.mrf.mxu0  ;;  %v863_v3 = vrot.slane %v2375_v16, %v862_v62 }
 0x482   :  { %v794_v6 = vpop.f32.mrf.mxu0 }
 0x484   :  { %v2045_v7 = vpop.f32.mrf.mxu0 }
 0x486   :  { %v910_v47 = vpop.f32.mrf.mxu0 }
 0x488   :  { %v2058_v48 = vpop.f32.mrf.mxu0 }
 0x48a   :  { %v913_v49 = vpop.f32.mrf.mxu0 }
 0x48c   :  { %v2059_v50 = vpop.f32.mrf.mxu0 }
 0x501   :  { %v692_v8 = vpop.xlane.xlu0 %691 }
 0x502   :  { %v693_v9 = vsub.f32 %v684_v60, %v692_v8 }
 0x504   :  { %v694_v11 = vmul.f32 1.442695, %v693_v9  ;;  %v911_v9 = vadd.f32 %v910_v47, %v863_v3 }
 0x506   :  { %2219 = vpow2.f32 %v694_v11 }
 0x509   :  { %v799_v13 = vpop.xlane.xlu1 %798 }
 0x50a   :  { %v800_v14 = vsub.f32 %v791_v2, %v799_v13 }
 0x50c   :  { %v801_v15 = vmul.f32 1.442695, %v800_v14  ;;  %v1041_v14 = vpack.c.bf16 %v911_v9, %v911_v9 }
 0x50e   :  { %2221 = vpow2.f32 %v801_v15 }
 0x513   :  { %v2220_v17 = vpop.eup %2219 }
 0x514   :  { %v696_v18 = vsel %vm288_vm3, %v2220_v17, 0.0 }
 0x515   :  { %697 = vadd.xlane.f32.xlu0 %v696_v18  ;;  %v914_v18 = vadd.f32 %v913_v49, %v863_v3 }
 0x51b   :  { %v2222_v19 = vpop.eup %2221 }
 0x51c   :  { %v803_v20 = vsel %vm288_vm3, %v2222_v19, 0.0 }
 0x51d   :  { %804 = vadd.xlane.f32.xlu1 %v803_v20  ;;  %v2199_v20 = vld [vmem:[%s2678_s5 + $0x28] sm:$0xff]  }
 0x51e   :  { %2069 = vmatpush3.bf16.msra.mxu0 %v2199_v20 }
 0x51f   :  { %2070 = vmatprep.subr.bf16.mxu0 %v2265_v1 }
 0x522   :  { %2071 = vmatpush3.bf16.msra.mxu0 %v2200_v21 }
 0x523   :  { %2082 = vmatprep.subr.bf16.mxu0 %v2265_v1 }
 0x525   :  { %2073 = vmatmul.mubr.msk.bf16.vlgmr.msra.gmra.mxu0 %vm65_vm1, %v2403_v40 }
 0x526   :  { %2084 = vmatprep.mubr.msk.bf16.mxu0 %vm2266_vm0, %v2265_v1 }
 0x59e   :  { %v698_v33 = vpop.xlane.xlu0 %697 }
 0x59f   :  { %2223 = vrcp.f32 %v698_v33  ;;  %v987_v33 = vrot.slane %v2415_v51, %v862_v62 }
 0x5a6   :  { %v805_v35 = vpop.xlane.xlu1 %804 }
 0x5a7   :  { %2225 = vrcp.f32 %v805_v35 }
 0x5ac   :  { %v2224_v36 = vpop.eup %2223 }
 0x5ad   :  { %v700_v38 = vmul.f32 %v2224_v36, %v2220_v17 }
 0x5af   :  { %v701_v39 = vpack.c.bf16 %v700_v38, %v700_v38 }
 0x5b1   :  { %2037 = vmatmul.mubr.msk.bf16.vlgmr.msra.gmra.mxu1 %vm288_vm3, %v701_v39 }
 0x5b2   :  { %2047 = vmatpush3.bf16.msra.mxu1 %v813_v41  ;;  %2048 = vmatprep.mubr.msk.bf16.mxu1 %vm2266_vm0, %v2265_v1 }
 0x5b3   :  { %2060 = vmatprep.subr.bf16.mxu1 %v2265_v1 }
 0x5b4   :  { %v2226_v42 = vpop.eup %2225 }
 0x5b5   :  { %v807_v43 = vmul.f32 %v2226_v42, %v2222_v19  ;;  %v1148_v19 = vpack.c.bf16 %v914_v18, %v914_v18 }
 0x5b7   :  { %v808_v45 = vpack.c.bf16 %v807_v43, %v807_v43 }
 0x5b9   :  { %2049 = vmatmul.mubr.msk.bf16.vlgmr.msra.gmra.mxu1 %vm288_vm3, %v808_v45 }
 0x5ba   :  { %2061 = vmatpush3.bf16.msra.mxu1 %v2195_v44  ;;  %2064 = vmatprep.mubr.msk.bf16.mxu1 %vm2266_vm0, %v2265_v1 }
 0x5bb   :  { %2062 = vmatprep.subr.bf16.mxu1 %v2265_v1 }
 0x5be   :  { %2063 = vmatpush3.bf16.msra.mxu1 %v2197_v46 }
 0x5bf   :  { %2076 = vmatprep.subr.bf16.mxu1 %v2265_v1 }
 0x5c1   :  { %2065 = vmatmul.mubr.msk.bf16.vlgmr.msra.gmra.mxu1 %vm65_vm1, %v2362_v10 }
 0x5c2   :  { %2078 = vmatprep.mubr.msk.bf16.mxu1 %vm2266_vm0, %v2265_v1 }
 0x5e5   :  { %v1034_v35 = vpop.f32.mrf.mxu0 }
 0x5e6   :  { %v1035_v36 = vadd.f32 %v1034_v35, %v987_v33 }
 0x5e7   :  { %v2074_v37 = vpop.f32.mrf.mxu0 }
 0x5e8   :  { %v1043_v38 = vpack.c.bf16 %v1035_v36, %v1035_v36 }
 0x5ea   :  { %v1106_v39 = vsel %vm304_vm4, %v1043_v38, 0 }
 0x5eb   :  { %2083 = vmatpush3.bf16.msra.mxu0 %v1106_v39 }
 0x5ec   :  { %2094 = vmatprep.subr.bf16.mxu0 %v2265_v1 }
 0x671   :  { %v2523_v52 = vpop.f32.mrf.mxu1 }
 0x673   :  { %v2038_v53 = vpop.f32.mrf.mxu1 }
 0x674   :  { %v1037_v53 = vpop.f32.mrf.mxu0 }
 0x675   :  { %v745_v54 = vpop.f32.mrf.mxu1 }
 0x676   :  { %v2075_v54 = vpop.f32.mrf.mxu0 }
 0x677   :  { %v2039_v55 = vpop.f32.mrf.mxu1 }
 0x678   :  { %v2202_v55 = vld [vmem:[%s2676_s3 + $0x38] sm:$0xff]  }
 0x679   :  { %v2525_v56 = vpop.f32.mrf.mxu1 }
 0x67a   :  { %v2168_v57 = vpack.i.bf16 %v2525_v56, %v2523_v52 }
 0x67b   :  { %v2050_v59 = vpop.f32.mrf.mxu1 }
 0x67d   :  { %v852_v60 = vpop.f32.mrf.mxu1 }
 0x67f   :  { %v2051_v63 = vpop.f32.mrf.mxu1 }
 0x681   :  { %v972_v0 = vpop.f32.mrf.mxu1 }
 0x682   :  { %v973_v2 = vadd.f32 %v972_v0, %v925_v61 }
 0x683   :  { %v2066_v4 = vpop.f32.mrf.mxu1 }
 0x684   :  { %v1042_v6 = vpack.c.bf16 %v973_v2, %v973_v2 }
 0x685   :  { %v975_v7 = vpop.f32.mrf.mxu1 }
 0x686   :  { %v1048_v8 = vsel %vm241_vm2, %v1042_v6, 0  ;;  %v976_v11 = vadd.f32 %v975_v7, %v925_v61  ;;  %v1038_v61 = vadd.f32 %v1037_v53, %v987_v33  ;;  %v2201_v6 = vld [vmem:[%s2677_s4 + $0x38] sm:$0xff]  }
 0x687   :  { %v2067_v13 = vpop.f32.mrf.mxu1  ;;  %2077 = vmatpush3.bf16.xpose.msra.mxu1 %v1048_v8  ;;  %v2203_v8 = vld [vmem:[%s2677_s4 + $0x30] sm:$0xff]  }
 0x688   :  { %2088 = vmatprep.subr.bf16.mxu1 %v2265_v1  ;;  %v1149_v15 = vpack.c.bf16 %v976_v11, %v976_v11  ;;  %v1150_v63 = vpack.c.bf16 %v1038_v61, %v1038_v61 }
 0x68a   :  { %v1155_v17 = vsel %vm241_vm2, %v1149_v15, 0  ;;  %v1213_v3 = vsel %vm304_vm4, %v1150_v63, 0 }
 0x68e   :  { %2079 = vmatmul.mubr.msk.bf16.vlgmr.msra.gmra.mxu1 %vm241_vm2, %v1041_v14 }
 0x68f   :  { %2089 = vmatpush3.bf16.xpose.msra.mxu1 %v1155_v17  ;;  %2090 = vmatprep.mubr.msk.bf16.mxu1 %vm2266_vm0, %v2265_v1 }
 0x690   :  { %2100 = vmatprep.subr.bf16.mxu1 %v2265_v1 }
 0x696   :  { %2091 = vmatmul.mubr.msk.bf16.vlgmr.msra.gmra.mxu1 %vm241_vm2, %v1148_v19 }
 0x697   :  { %2104 = vmatprep.mubr.msk.bf16.mxu1 %vm2266_vm0, %v2265_v1  ;;  %2101 = vmatpush3.bf16.msra.mxu1 %v2202_v55 }
 0x698   :  { %2102 = vmatprep.subr.bf16.mxu1 %v2265_v1 }
 0x69b   :  { %2103 = vmatpush3.bf16.msra.mxu1 %v2204_v58 }
 0x69c   :  { %2116 = vmatprep.subr.bf16.mxu1 %v2265_v1 }
 0x69e   :  { %2105 = vmatmul.mubr.msk.bf16.vlgmr.msra.gmra.mxu1 %vm65_vm1, %v2342_v5 }
 0x69f   :  { %2120 = vmatprep.mubr.msk.bf16.mxu1 %vm2266_vm0, %v2265_v1 }
 0x74e   :  { %v1084_v22 = vpop.f32.mrf.mxu1 }
 0x74f   :  { %v1090_v23 = vsel %vm288_vm3, %v1084_v22, -inf }
 0x750   :  { %1091 = vmax.xlane.f32.xlu0 %v1090_v23  ;;  %v2080_v24 = vpop.f32.mrf.mxu1 }
 0x752   :  { %v1087_v25 = vpop.f32.mrf.mxu1 }
 0x753   :  { %v1262_v25 = vsub.s32 3, %v2369_v12 }
 0x754   :  { %v2081_v26 = vpop.f32.mrf.mxu1 }
 0x756   :  { %v1191_v27 = vpop.f32.mrf.mxu1 }
 0x757   :  { %v1197_v28 = vsel %vm288_vm3, %v1191_v27, -inf }
 0x758   :  { %1198 = vmax.xlane.f32.xlu1 %v1197_v28  ;;  %v2092_v29 = vpop.f32.mrf.mxu1 }
 0x759   :  { %v1263_v29 = vrot.slane %v2375_v16, %v1262_v25 }
 0x75a   :  { %v1194_v31 = vpop.f32.mrf.mxu1 }
 0x75c   :  { %v2093_v32 = vpop.f32.mrf.mxu1 }
 0x75e   :  { %v1310_v9 = vpop.f32.mrf.mxu1 }
 0x75f   :  { %v1311_v36 = vadd.f32 %v1310_v9, %v1263_v29 }
 0x760   :  { %v2106_v11 = vpop.f32.mrf.mxu1 }
 0x761   :  { %v1441_v39 = vpack.c.bf16 %v1311_v36, %v1311_v36 }
 0x762   :  { %v1313_v13 = vpop.f32.mrf.mxu1 }
 0x764   :  { %v2107_v14 = vpop.f32.mrf.mxu1 }
 0x7d9   :  { %v1092_v41 = vpop.xlane.xlu0 %1091 }
 0x7da   :  { %v1093_v42 = vsub.f32 %v1084_v22, %v1092_v41  ;;  %v1324_v22 = vsub.s32 7, %v2369_v12 }
 0x7dc   :  { %v1094_v43 = vmul.f32 1.442695, %v1093_v42  ;;  %v1325_v24 = vrot.slane %v2375_v16, %v1324_v22  ;;  %v1314_v16 = vadd.f32 %v1313_v13, %v1263_v29 }
 0x7de   :  { %2227 = vpow2.f32 %v1094_v43  ;;  %v1548_v42 = vpack.c.bf16 %v1314_v16, %v1314_v16  ;;  %v2205_v43 = vld [vmem:[%s2678_s5 + $0x38] sm:$0xff]  }
 0x7df   :  { %2117 = vmatpush3.bf16.msra.mxu1 %v2205_v43 }
 0x7e0   :  { %2118 = vmatprep.subr.bf16.mxu1 %v2265_v1 }
 0x7e1   :  { %v1199_v44 = vpop.xlane.xlu1 %1198 }
 0x7e2   :  { %v1200_v45 = vsub.f32 %v1191_v27, %v1199_v44  ;;  %v2206_v44 = vld [vmem:[%s2678_s5 + $0x30] sm:$0xff]   ;;  %s2267_s5 = smov 16  }
 0x7e3   :  { %2119 = vmatpush3.bf16.msra.mxu1 %v2206_v44 }
 0x7e4   :  { %v1201_v46 = vmul.f32 1.442695, %v1200_v45  ;;  %2130 = vmatprep.subr.bf16.mxu1 %v2265_v1 }
 0x7e6   :  { %2229 = vpow2.f32 %v1201_v46  ;;  %2121 = vmatmul.mubr.msk.bf16.vlgmr.msra.gmra.mxu1 %vm65_vm1, %v2403_v40 }
 0x7e7   :  { %2132 = vmatprep.mubr.msk.bf16.mxu1 %vm2266_vm0, %v2265_v1 }
 0x7eb   :  { %v2228_v47 = vpop.eup %2227 }
 0x7ec   :  { %v1096_v48 = vsel %vm288_vm3, %v2228_v47, 0.0 }
 0x7ed   :  { %1097 = vadd.xlane.f32.xlu0 %v1096_v48 }
 0x7f3   :  { %v2230_v49 = vpop.eup %2229 }
 0x7f4   :  { %v1203_v50 = vsel %vm288_vm3, %v2230_v49, 0.0 }
 0x7f5   :  { %1204 = vadd.xlane.f32.xlu1 %v1203_v50 }
 0x876   :  { %v1098_v59 = vpop.xlane.xlu0 %1097 }
 0x877   :  { %2231 = vrcp.f32 %v1098_v59 }
 0x87e   :  { %v1205_v60 = vpop.xlane.xlu1 %1204 }
 0x87f   :  { %2233 = vrcp.f32 %v1205_v60 }
 0x884   :  { %v2232_v62 = vpop.eup %2231 }
 0x885   :  { %v1100_v0 = vmul.f32 %v2232_v62, %v2228_v47 }
 0x887   :  { %v1101_v2 = vpack.c.bf16 %v1100_v0, %v1100_v0 }
 0x889   :  { %2085 = vmatmul.mubr.msk.bf16.vlgmr.msra.gmra.mxu0 %vm288_vm3, %v1101_v2 }
 0x88a   :  { %2095 = vmatpush3.bf16.msra.mxu0 %v1213_v3  ;;  %2096 = vmatprep.mubr.msk.bf16.mxu0 %vm2266_vm0, %v2265_v1 }
 0x88b   :  { %2108 = vmatprep.subr.bf16.mxu0 %v2265_v1 }
 0x88c   :  { %v2234_v5 = vpop.eup %2233 }
 0x88d   :  { %v1207_v4 = vmul.f32 %v2234_v5, %v2230_v49 }
 0x88f   :  { %v1208_v7 = vpack.c.bf16 %v1207_v4, %v1207_v4  ;;  %v1387_v4 = vrot.slane %v2415_v51, %v1262_v25  ;;  %v2210_v25 = vld [vmem:[%s2679_s6] sm:$0xff]  }
 0x891   :  { %2097 = vmatmul.mubr.msk.bf16.vlgmr.msra.gmra.mxu0 %vm288_vm3, %v1208_v7 }
 0x892   :  { %2109 = vmatpush3.bf16.msra.mxu0 %v2201_v6  ;;  %2112 = vmatprep.mubr.msk.bf16.mxu0 %vm2266_vm0, %v2265_v1 }
 0x893   :  { %2110 = vmatprep.subr.bf16.mxu0 %v2265_v1 }
 0x896   :  { %2111 = vmatpush3.bf16.msra.mxu0 %v2203_v8 }
 0x897   :  { %2124 = vmatprep.subr.bf16.mxu0 %v2265_v1 }
 0x899   :  { %2113 = vmatmul.mubr.msk.bf16.vlgmr.msra.gmra.mxu0 %vm65_vm1, %v2362_v10 }
 0x89a   :  { %2126 = vmatprep.mubr.msk.bf16.mxu0 %vm2266_vm0, %v2265_v1 }
 0x8a6   :  { %v1434_v6 = vpop.f32.mrf.mxu1 }
 0x8a7   :  { %v1435_v7 = vadd.f32 %v1434_v6, %v1387_v4 }
 0x8a8   :  { %v2122_v8 = vpop.f32.mrf.mxu1 }
 0x8a9   :  { %v1443_v9 = vpack.c.bf16 %v1435_v7, %v1435_v7 }
 0x8aa   :  { %v1437_v13 = vpop.f32.mrf.mxu1 }
 0x8ab   :  { %v1506_v11 = vsel %vm304_vm4, %v1443_v9, 0  ;;  %v1438_v14 = vadd.f32 %v1437_v13, %v1387_v4 }
 0x8ac   :  { %2131 = vmatpush3.bf16.msra.mxu1 %v1506_v11 }
 0x8ad   :  { %2142 = vmatprep.subr.bf16.mxu1 %v2265_v1  ;;  %v1550_v22 = vpack.c.bf16 %v1438_v14, %v1438_v14 }
 0x949   :  { %v2594_v15 = vpop.f32.mrf.mxu0 }
 0x94b   :  { %v2086_v17 = vpop.f32.mrf.mxu0 }
 0x94c   :  { %v2123_v17 = vpop.f32.mrf.mxu1 }
 0x94d   :  { %v1145_v18 = vpop.f32.mrf.mxu0 }
 0x94f   :  { %v2087_v19 = vpop.f32.mrf.mxu0 }
 0x951   :  { %v2596_v20 = vpop.f32.mrf.mxu0 }
 0x952   :  { %v2173_v21 = vpack.i.bf16 %v2596_v20, %v2594_v15  ;;  %v2207_v15 = vld [vmem:[%s2679_s6 + $0x18] sm:$0xff]   ;;  %v2208_v20 = vld [vmem:[%s2679_s6 + $0x10] sm:$0xff]  }
 0x953   :  { %v2098_v10 = vpop.f32.mrf.mxu0 }
 0x955   :  { %v1252_v23 = vpop.f32.mrf.mxu0 }
 0x957   :  { %v2099_v26 = vpop.f32.mrf.mxu0 }
 0x959   :  { %v1372_v27 = vpop.f32.mrf.mxu0 }
 0x95a   :  { %v1373_v28 = vadd.f32 %v1372_v27, %v1325_v24 }
 0x95b   :  { %v2114_v31 = vpop.f32.mrf.mxu0 }
 0x95c   :  { %v1442_v32 = vpack.c.bf16 %v1373_v28, %v1373_v28 }
 0x95d   :  { %v1375_v33 = vpop.f32.mrf.mxu0 }
 0x95e   :  { %v1448_v35 = vsel %vm241_vm2, %v1442_v32, 0  ;;  %v1376_v37 = vadd.f32 %v1375_v33, %v1325_v24  ;;  %v1613_v24 = vsel %vm304_vm4, %v1550_v22, 0 }
 0x95f   :  { %v2115_v38 = vpop.f32.mrf.mxu0  ;;  %2125 = vmatpush3.bf16.xpose.msra.mxu0 %v1448_v35 }
 0x960   :  { %2136 = vmatprep.subr.bf16.mxu0 %v2265_v1  ;;  %v1549_v41 = vpack.c.bf16 %v1376_v37, %v1376_v37 }
 0x962   :  { %v1555_v12 = vsel %vm241_vm2, %v1549_v41, 0 }
 0x966   :  { %2127 = vmatmul.mubr.msk.bf16.vlgmr.msra.gmra.mxu0 %vm241_vm2, %v1441_v39 }
 0x967   :  { %2137 = vmatpush3.bf16.xpose.msra.mxu0 %v1555_v12  ;;  %2138 = vmatprep.mubr.msk.bf16.mxu0 %vm2266_vm0, %v2265_v1 }
 0x968   :  { %2148 = vmatprep.subr.bf16.mxu0 %v2265_v1 }
 0x96e   :  { %2139 = vmatmul.mubr.msk.bf16.vlgmr.msra.gmra.mxu0 %vm241_vm2, %v1548_v42 }
 0x96f   :  { %2156 = vmatprep.mubr.msk.bf16.mxu0 %vm2266_vm0, %v2265_v1  ;;  %2149 = vmatpush3.bf16.msra.mxu0 %v2207_v15 }
 0x970   :  { %2150 = vmatprep.subr.bf16.mxu0 %v2265_v1 }
 0x973   :  { %2151 = vmatpush3.bf16.msra.mxu0 %v2208_v20 }
 0x974   :  { %2152 = vmatprep.subr.bf16.mxu0 %v2265_v1 }
 0xa26   :  { %v1484_v45 = vpop.f32.mrf.mxu0 }
 0xa27   :  { %v1490_v46 = vsel %vm288_vm3, %v1484_v45, -inf }
 0xa28   :  { %1491 = vmax.xlane.f32.xlu0 %v1490_v46  ;;  %v2128_v47 = vpop.f32.mrf.mxu0 }
 0xa2a   :  { %v1487_v48 = vpop.f32.mrf.mxu0 }
 0xa2c   :  { %v2129_v49 = vpop.f32.mrf.mxu0 }
 0xa2e   :  { %v1591_v50 = vpop.f32.mrf.mxu0 }
 0xa2f   :  { %v1597_v53 = vsel %vm288_vm3, %v1591_v50, -inf }
 0xa30   :  { %1598 = vmax.xlane.f32.xlu1 %v1597_v53  ;;  %v2140_v54 = vpop.f32.mrf.mxu0  ;;  %v1877_v53 = vld [vmem:[%s2681_s8] ss:$0 sm:$0xff] }
 0xa32   :  { %v1594_v55 = vpop.f32.mrf.mxu0 }
 0xa34   :  { %v2141_v58 = vpop.f32.mrf.mxu0 }
 0xab1   :  { %v1492_v59 = vpop.xlane.xlu0 %1491 }
 0xab2   :  { %v1493_v60 = vsub.f32 %v1484_v45, %v1492_v59 }
 0xab4   :  { %v1494_v40 = vmul.f32 1.442695, %v1493_v60 }
 0xab6   :  { %2235 = vpow2.f32 %v1494_v40 }
 0xab9   :  { %v1599_v61 = vpop.xlane.xlu1 %1598 }
 0xaba   :  { %v1600_v62 = vsub.f32 %v1591_v50, %v1599_v61 }
 0xabc   :  { %v1601_v63 = vmul.f32 1.442695, %v1600_v62 }
 0xabe   :  { %2237 = vpow2.f32 %v1601_v63 }
 0xac3   :  { %v2236_v0 = vpop.eup %2235 }
 0xac4   :  { %v1496_v2 = vsel %vm288_vm3, %v2236_v0, 0.0 }
 0xac5   :  { %1497 = vadd.xlane.f32.xlu0 %v1496_v2 }
 0xacb   :  { %v2238_v3 = vpop.eup %2237 }
 0xacc   :  { %v1603_v5 = vsel %vm288_vm3, %v2238_v3, 0.0 }
 0xacd   :  { %1604 = vadd.xlane.f32.xlu1 %v1603_v5 }
 0xadb   :  { %2169 = vrot.lane.b32.xlu0 %v2168_v57, %s2267_s5 }
 0xade   :  { %2174 = vrot.lane.b32.xlu1 %v2173_v21, %s2268_s0  ;;  %v2209_v21 = vld [vmem:[%s2679_s6 + $0x8] sm:$0xff]  }
 0xadf   :  { %2153 = vmatpush3.bf16.msra.mxu0 %v2209_v21 }
 0xae0   :  { %2154 = vmatprep.subr.bf16.mxu0 %v2265_v1 }
 0xae3   :  { %2155 = vmatpush3.bf16.msra.mxu0 %v2210_v25 }
 0xb4e   :  { %v1498_v51 = vpop.xlane.xlu0 %1497 }
 0xb4f   :  { %2239 = vrcp.f32 %v1498_v51 }
 0xb52   :  { %v2170_v37 = vpop.permute.xlu0 %2169 }
 0xb53   :  { %v2172_v39 = vunpack.i.h.bf16 %v2170_v37 }
 0xb55   :  { %v1683_v42 = vsel %vm241_vm2, %v2456_v34, %v2172_v39 }
 0xb56   :  { %v1605_v18 = vpop.xlane.xlu1 %1604 }
 0xb57   :  { %2241 = vrcp.f32 %v1605_v18 }
 0xb5a   :  { %v2175_v38 = vpop.permute.xlu1 %2174 }
 0xb5b   :  { %v2177_v41 = vunpack.i.h.bf16 %v2175_v38  ;;  %v2176_v12 = vunpack.i.l.bf16 %v2175_v38 }
 0xb5c   :  { %v2240_v19 = vpop.eup %2239 }
 0xb5d   :  { %v1500_v10 = vmul.f32 %v2240_v19, %v2236_v0  ;;  %v1684_v46 = vsel %vm65_vm1, %v1683_v42, %v2177_v41 }
 0xb5f   :  { %v1501_v23 = vpack.c.bf16 %v1500_v10, %v1500_v10 }
 0xb61   :  { %2133 = vmatmul.mubr.msk.bf16.vlgmr.msra.gmra.mxu1 %vm288_vm3, %v1501_v23 }
 0xb62   :  { %2143 = vmatpush3.bf16.msra.mxu1 %v1613_v24  ;;  %2144 = vmatprep.mubr.msk.bf16.mxu1 %vm2266_vm0, %v2265_v1  ;;  %v2171_v1 = vunpack.i.l.bf16 %v2170_v37 }
 0xb64   :  { %v2242_v52 = vpop.eup %2241  ;;  %v1667_v43 = vsel %vm241_vm2, %v2454_v30, %v2171_v1 }
 0xb65   :  { %v1607_v56 = vmul.f32 %v2242_v52, %v2238_v3  ;;  %v1668_v47 = vsel %vm65_vm1, %v1667_v43, %v2176_v12 }
 0xb67   :  { %v1608_v57 = vpack.c.bf16 %v1607_v56, %v1607_v56 }
 0xb69   :  { %2145 = vmatmul.mubr.msk.bf16.vlgmr.msra.gmra.mxu1 %vm288_vm3, %v1608_v57 }
 0xc21   :  { %v1542_v26 = vpop.f32.mrf.mxu1 }
 0xc23   :  { %v2134_v27 = vpop.f32.mrf.mxu1 }
 0xc25   :  { %v1545_v28 = vpop.f32.mrf.mxu1 }
 0xc27   :  { %v2135_v29 = vpop.f32.mrf.mxu1 }
 0xc29   :  { %v1649_v31 = vpop.f32.mrf.mxu1 }
 0xc2a   :  { %v2178_v32 = vpack.i.bf16 %v1649_v31, %v1542_v26 }
 0xc2b   :  { %v2146_v33 = vpop.f32.mrf.mxu1 }
 0xc2c   :  { %2179 = vrot.lane.b32.xlu1 %v2178_v32, %s2269_s28 }
 0xc2d   :  { %v1652_v35 = vpop.f32.mrf.mxu1 }
 0xc2f   :  { %v2147_v36 = vpop.f32.mrf.mxu1 }
 0xc9e   :  { %v2180_v16 = vpop.permute.xlu1 %2179 }
 0xc9f   :  { %v2182_v44 = vunpack.i.h.bf16 %v2180_v16  ;;  %v2181_v45 = vunpack.i.l.bf16 %v2180_v16 }
 0xca1   :  { %v1685_v48 = vsel %vm1669_vm5, %v1684_v46, %v2182_v44  ;;  %v1670_v49 = vsel %vm1669_vm5, %v1668_v47, %v2181_v45 }
 0xca2   :  { %v1686_v50 = vpack.c.bf16 %v1685_v48, %v1670_v49 }
 0xca4   :  { %2157 = vmatmul.mubr.msk.bf16.vlgmr.msra.gmra.mxu0 %vm1726_vm6, %v1686_v50 }
 0xd64   :  { %v1764_v54 = vpop.f32.mrf.mxu0 }
 0xd65   :  { %v1765_v34 = vadd.f32 %v1877_v53, %v1764_v54 }
 0xd66   :  { %v2158_v55 = vpop.f32.mrf.mxu0 }
 0xd67   :  { %1771 = vst.msk [vmem:[#allocation2] sm:$0xff] %vm65_vm1, %v1765_v34 }
 0xd68   :  { %v1767_v30 = vpop.f32.mrf.mxu0 }
 0xd69   :  { %v1768_v58 = vadd.f32 %v1877_v53, %v1767_v30 }
 0xd6a   :  { %v2159_v59 = vpop.f32.mrf.mxu0 }
 0xd6b   :  { %1772 = vst.msk [vmem:[#allocation2 + $0x8] sm:$0xff] %vm65_vm1, %v1768_v58 }
 0xd6c   :  { %2254 = shalt.err (!%p2251_p4)
}
 0xd6d   :  { %s2271_s8 = smov 128   ;;  %s2272_s2 = smov 8  }
 0xd6e   :  { %1784 = dma.vmem_to_hbm [thread:$0]  %s1779_s10, 256, %s2682_s9, [#allocation3], %s2271_s8, %s2271_s8, %s2272_s2  }
 0xd6f   :  { %2263 = dma.done.wait [#allocation3], 256  }
 0xd70   :  { %2264 = vsyncadd [#allocation3], 4294967040 }
 0xd71   :  { %1788 = vsyncpa [#allocation3], 1 }

</bundles_post_ra>
